<compile_context>
chip_gen: v5e
topology: v5e:2x2
jax: 0.10.0
libtpu: 0.0.40
codegen_flags: <defaults>
</compile_context>

<pallas_src>
import jax
import jax.numpy as jnp
from jax.experimental import pallas as pl
from jax.experimental.pallas import tpu as pltpu

IN_FEATURES = 28 * 28   # 784
HIDDEN = 512
OUT_FEATURES = 10
OUT_PAD = 128           # lane-dense logits block; wrapper slices to 10
TM_MAX = 512            # max batch-tile rows per grid step


def _round_up(x, m):
    return (x + m - 1) // m * m


def mlp_kernel(x_ref, w1_ref, b1_ref, w2_ref, b2_ref, w3_ref, b3_ref, o_ref):
    # x: [tm, 784] f32 (cast to bf16 in-kernel); w*: bf16; b*: f32; out: bf16.
    x = x_ref[...].astype(jnp.bfloat16)

    h1 = jnp.dot(x, w1_ref[...], preferred_element_type=jnp.float32)
    h1 = jnp.maximum(h1 + b1_ref[...], 0.0)                      # f32 epilogue

    h2 = jnp.dot(h1.astype(jnp.bfloat16), w2_ref[...],
                 preferred_element_type=jnp.float32)
    h2 = jnp.maximum(h2 + b2_ref[...], 0.0)                      # f32 epilogue

    h3 = jnp.dot(h2.astype(jnp.bfloat16), w3_ref[...],
                 preferred_element_type=jnp.float32)
    o_ref[...] = (h3 + b3_ref[...]).astype(o_ref.dtype)


def prepare_params(params):
    """One-time pad + cast of PyTorch-semantics f32 params for the TPU kernel."""
    w1, b1, w2, b2, w3, b3 = params
    w3p = jnp.zeros((HIDDEN, OUT_PAD), jnp.float32).at[:, :OUT_FEATURES].set(w3)
    b3p = jnp.zeros((1, OUT_PAD), jnp.float32).at[:, :OUT_FEATURES].set(b3)
    return (w1.astype(jnp.bfloat16), b1.astype(jnp.float32),
            w2.astype(jnp.bfloat16), b2.astype(jnp.float32),
            w3p.astype(jnp.bfloat16), b3p.astype(jnp.float32))


def _pick_tile(bp):
    """Batch tile: whole batch if small, else >=2 grid steps with tm % 256 == 0."""
    if bp <= 256:
        return bp
    return min(TM_MAX, _round_up((bp + 1) // 2, 256))


@jax.jit
def neural_network_forward(x, prepared_params):
    """x: [B, 1, 28, 28] (NCHW, float32). Returns logits [B, 10] (float32)."""
    w1, b1, w2, b2, w3, b3 = prepared_params
    B = x.shape[0]

    # nn.Flatten(): flatten all dims except batch, row-major.
    x2d = x.reshape(B, -1)
    assert x2d.shape[1] == IN_FEATURES

    # Pad batch only to a multiple of 8 (sublane alignment); no K padding and
    # no wrapper-side cast — the kernel reads f32 and casts to bf16 itself.
    bp = _round_up(B, 8)
    if bp != B:
        x2d = jnp.pad(x2d, ((0, bp - B), (0, 0)))

    tm = _pick_tile(bp)
    steps = pl.cdiv(bp, tm)   # ragged trailing block handled by Pallas masking

    flops = 2 * bp * (IN_FEATURES * HIDDEN + HIDDEN * HIDDEN + HIDDEN * OUT_PAD)
    bytes_accessed = (bp * IN_FEATURES * 4
                      + (w1.size + w2.size + w3.size) * 2
                      + (b1.size + b2.size + b3.size) * 4
                      + bp * OUT_PAD * 2)

    out = pl.pallas_call(
        mlp_kernel,
        out_shape=jax.ShapeDtypeStruct((bp, OUT_PAD), jnp.bfloat16),
        grid=(steps,),
        in_specs=[
            pl.BlockSpec((tm, IN_FEATURES), lambda i: (i, 0)),     # x tile (pipelined)
            pl.BlockSpec((IN_FEATURES, HIDDEN), lambda i: (0, 0)), # w1 (resident)
            pl.BlockSpec((1, HIDDEN), lambda i: (0, 0)),           # b1
            pl.BlockSpec((HIDDEN, HIDDEN), lambda i: (0, 0)),      # w2 (resident)
            pl.BlockSpec((1, HIDDEN), lambda i: (0, 0)),           # b2
            pl.BlockSpec((HIDDEN, OUT_PAD), lambda i: (0, 0)),     # w3 (resident)
            pl.BlockSpec((1, OUT_PAD), lambda i: (0, 0)),          # b3
        ],
        out_specs=pl.BlockSpec((tm, OUT_PAD), lambda i: (i, 0)),
        compiler_params=pltpu.CompilerParams(
            dimension_semantics=("parallel",),
            vmem_limit_bytes=32 << 20,
        ),
        cost_estimate=pl.CostEstimate(
            flops=flops, transcendentals=0, bytes_accessed=bytes_accessed),
    )(x2d, w1, b1, w2, b2, w3, b3)

    return out[:B, :OUT_FEATURES].astype(jnp.float32)


def init_params(key):
    """PyTorch Linear default init: U(-1/sqrt(fan_in), 1/sqrt(fan_in)), f32."""
    ks = jax.random.split(key, 6)

    def linear(kw, kb, fan_in, fan_out):
        bound = 1.0 / jnp.sqrt(float(fan_in))
        # Stored as [in, out] so the kernel computes x @ W (== x @ W_torch.T).
        w = jax.random.uniform(kw, (fan_in, fan_out), jnp.float32, -bound, bound)
        b = jax.random.uniform(kb, (1, fan_out), jnp.float32, -bound, bound)
        return w, b

    w1, b1 = linear(ks[0], ks[1], IN_FEATURES, HIDDEN)
    w2, b2 = linear(ks[2], ks[3], HIDDEN, HIDDEN)
    w3, b3 = linear(ks[4], ks[5], HIDDEN, OUT_FEATURES)
    return (w1, b1, w2, b2, w3, b3)


if __name__ == "__main__":
    key = jax.random.PRNGKey(0)
    k_params, k_x = jax.random.split(key)

    params = init_params(k_params)
    prepared = prepare_params(params)

    # Small MNIST-like batch: [B=8, C=1, H=28, W=28]
    x = jax.random.normal(k_x, (8, 1, 28, 28), dtype=jnp.float32)

    logits = neural_network_forward(x, prepared)
    jax.block_until_ready(logits)

    # Plain-JAX reference mirroring the kernel's bf16 cast points.
    w1, b1, w2, b2, w3, b3 = params
    xf = x.reshape(x.shape[0], -1)
    bf = lambda a: a.astype(jnp.bfloat16).astype(jnp.float32)
    ref = jnp.maximum(jnp.dot(bf(xf), bf(w1)) + b1, 0.0)
    ref = jnp.maximum(jnp.dot(bf(ref), bf(w2)) + b2, 0.0)
    ref = jnp.dot(bf(ref), bf(w3)) + b3
    ref = ref.astype(jnp.bfloat16).astype(jnp.float32)   # kernel stores bf16 logits

    assert logits.shape == (8, 10)
    assert logits.dtype == jnp.float32
    assert jnp.allclose(logits, ref, atol=2e-2, rtol=2e-2), (
        float(jnp.max(jnp.abs(logits - ref))))

    print("KERNEL_OK")
</pallas_src>

<mosaic_0001>
module attributes {stable_mosaic.version = 11 : i64} {
  func.func @mlp_kernel(%arg0: i32, %arg1: memref<8x784xf32, #tpu.memory_space<vmem>>, %arg2: memref<784x512xbf16, #tpu.memory_space<vmem>>, %arg3: memref<1x512xf32, #tpu.memory_space<vmem>>, %arg4: memref<512x512xbf16, #tpu.memory_space<vmem>>, %arg5: memref<1x512xf32, #tpu.memory_space<vmem>>, %arg6: memref<512x128xbf16, #tpu.memory_space<vmem>>, %arg7: memref<1x128xf32, #tpu.memory_space<vmem>>, %arg8: memref<8x128xbf16, #tpu.memory_space<vmem>>) attributes {dimension_semantics = [#tpu.dimension_semantics<parallel>], iteration_bounds = array<i64: 1>, scalar_prefetch = 0 : i64, scratch_operands = 0 : i64, tpu.core_type = #tpu.core_type<tc>, window_params = [{transform_indices = @transform_0, window_bounds = array<i64: 8, 784>}, {pipeline_mode = #tpu.pipeline_mode<synchronous>, transform_indices = @transform_1, window_bounds = array<i64: 784, 512>}, {pipeline_mode = #tpu.pipeline_mode<synchronous>, transform_indices = @transform_2, window_bounds = array<i64: 1, 512>}, {pipeline_mode = #tpu.pipeline_mode<synchronous>, transform_indices = @transform_3, window_bounds = array<i64: 512, 512>}, {pipeline_mode = #tpu.pipeline_mode<synchronous>, transform_indices = @transform_4, window_bounds = array<i64: 1, 512>}, {pipeline_mode = #tpu.pipeline_mode<synchronous>, transform_indices = @transform_5, window_bounds = array<i64: 512, 128>}, {pipeline_mode = #tpu.pipeline_mode<synchronous>, transform_indices = @transform_6, window_bounds = array<i64: 1, 128>}, {transform_indices = @transform_7, window_bounds = array<i64: 8, 128>}]} {
    %c0 = arith.constant 0 : index
    %c0_0 = arith.constant 0 : index
    %0 = vector.load %arg1[%c0, %c0_0] : memref<8x784xf32, #tpu.memory_space<vmem>>, vector<8x784xf32>
    %1 = arith.truncf %0 : vector<8x784xf32> to vector<8x784xbf16>
    %c0_1 = arith.constant 0 : index
    %c0_2 = arith.constant 0 : index
    %2 = vector.load %arg2[%c0_1, %c0_2] : memref<784x512xbf16, #tpu.memory_space<vmem>>, vector<784x512xbf16>
    %cst = arith.constant dense<0.000000e+00> : vector<8x512xf32>
    %3 = tpu.matmul %1, %2, %cst {dimension_numbers = #tpu.dot_dimension_numbers<[1], [0], [0], [1], [0, 0, 1, 1], [], []>} : vector<8x784xbf16>, vector<784x512xbf16>, vector<8x512xf32> -> vector<8x512xf32>
    %c0_3 = arith.constant 0 : index
    %c0_4 = arith.constant 0 : index
    %4 = vector.load %arg3[%c0_3, %c0_4] : memref<1x512xf32, #tpu.memory_space<vmem>>, vector<1x512xf32>
    %5 = vector.broadcast %4 : vector<1x512xf32> to vector<8x512xf32>
    %6 = arith.addf %3, %5 : vector<8x512xf32>
    %cst_5 = arith.constant 0.000000e+00 : f32
    %7 = vector.broadcast %cst_5 : f32 to vector<8x512xf32>
    %8 = arith.maximumf %6, %7 : vector<8x512xf32>
    %9 = arith.truncf %8 : vector<8x512xf32> to vector<8x512xbf16>
    %c0_6 = arith.constant 0 : index
    %c0_7 = arith.constant 0 : index
    %10 = vector.load %arg4[%c0_6, %c0_7] : memref<512x512xbf16, #tpu.memory_space<vmem>>, vector<512x512xbf16>
    %cst_8 = arith.constant dense<0.000000e+00> : vector<8x512xf32>
    %11 = tpu.matmul %9, %10, %cst_8 {dimension_numbers = #tpu.dot_dimension_numbers<[1], [0], [0], [1], [0, 0, 1, 1], [], []>} : vector<8x512xbf16>, vector<512x512xbf16>, vector<8x512xf32> -> vector<8x512xf32>
    %c0_9 = arith.constant 0 : index
    %c0_10 = arith.constant 0 : index
    %12 = vector.load %arg5[%c0_9, %c0_10] : memref<1x512xf32, #tpu.memory_space<vmem>>, vector<1x512xf32>
    %13 = vector.broadcast %12 : vector<1x512xf32> to vector<8x512xf32>
    %14 = arith.addf %11, %13 : vector<8x512xf32>
    %cst_11 = arith.constant 0.000000e+00 : f32
    %15 = vector.broadcast %cst_11 : f32 to vector<8x512xf32>
    %16 = arith.maximumf %14, %15 : vector<8x512xf32>
    %17 = arith.truncf %16 : vector<8x512xf32> to vector<8x512xbf16>
    %c0_12 = arith.constant 0 : index
    %c0_13 = arith.constant 0 : index
    %18 = vector.load %arg6[%c0_12, %c0_13] : memref<512x128xbf16, #tpu.memory_space<vmem>>, vector<512x128xbf16>
    %cst_14 = arith.constant dense<0.000000e+00> : vector<8x128xf32>
    %19 = tpu.matmul %17, %18, %cst_14 {dimension_numbers = #tpu.dot_dimension_numbers<[1], [0], [0], [1], [0, 0, 1, 1], [], []>} : vector<8x512xbf16>, vector<512x128xbf16>, vector<8x128xf32> -> vector<8x128xf32>
    %c0_15 = arith.constant 0 : index
    %c0_16 = arith.constant 0 : index
    %20 = vector.load %arg7[%c0_15, %c0_16] : memref<1x128xf32, #tpu.memory_space<vmem>>, vector<1x128xf32>
    %21 = vector.broadcast %20 : vector<1x128xf32> to vector<8x128xf32>
    %22 = arith.addf %19, %21 : vector<8x128xf32>
    %23 = arith.truncf %22 : vector<8x128xf32> to vector<8x128xbf16>
    %c0_17 = arith.constant 0 : index
    %c0_18 = arith.constant 0 : index
    %24 = vector.load %arg8[%c0_17, %c0_18] : memref<8x128xbf16, #tpu.memory_space<vmem>>, vector<8x128xbf16>
    tpu.vector_store %arg8[%c0_17, %c0_18], %23 {strides = array<i32>} : memref<8x128xbf16, #tpu.memory_space<vmem>>, vector<8x128xbf16>,
    return
  }
  func.func @transform_0(%arg0: i32) -> (i32, i32) {
    %c0_i32 = arith.constant 0 : i32
    %c0_i32_0 = arith.constant 0 : i32
    return %arg0, %c0_i32 : i32, i32
  }
  func.func @transform_1(%arg0: i32) -> (i32, i32) {
    %c0_i32 = arith.constant 0 : i32
    %c0_i32_0 = arith.constant 0 : i32
    %c0_i32_1 = arith.constant 0 : i32
    return %c0_i32, %c0_i32_0 : i32, i32
  }
  func.func @transform_2(%arg0: i32) -> (i32, i32) {
    %c0_i32 = arith.constant 0 : i32
    %c0_i32_0 = arith.constant 0 : i32
    %c0_i32_1 = arith.constant 0 : i32
    return %c0_i32, %c0_i32_0 : i32, i32
  }
  func.func @transform_3(%arg0: i32) -> (i32, i32) {
    %c0_i32 = arith.constant 0 : i32
    %c0_i32_0 = arith.constant 0 : i32
    %c0_i32_1 = arith.constant 0 : i32
    return %c0_i32, %c0_i32_0 : i32, i32
  }
  func.func @transform_4(%arg0: i32) -> (i32, i32) {
    %c0_i32 = arith.constant 0 : i32
    %c0_i32_0 = arith.constant 0 : i32
    %c0_i32_1 = arith.constant 0 : i32
    return %c0_i32, %c0_i32_0 : i32, i32
  }
  func.func @transform_5(%arg0: i32) -> (i32, i32) {
    %c0_i32 = arith.constant 0 : i32
    %c0_i32_0 = arith.constant 0 : i32
    %c0_i32_1 = arith.constant 0 : i32
    return %c0_i32, %c0_i32_0 : i32, i32
  }
  func.func @transform_6(%arg0: i32) -> (i32, i32) {
    %c0_i32 = arith.constant 0 : i32
    %c0_i32_0 = arith.constant 0 : i32
    %c0_i32_1 = arith.constant 0 : i32
    return %c0_i32, %c0_i32_0 : i32, i32
  }
  func.func @transform_7(%arg0: i32) -> (i32, i32) {
    %c0_i32 = arith.constant 0 : i32
    %c0_i32_0 = arith.constant 0 : i32
    return %arg0, %c0_i32 : i32, i32
  }
}

</mosaic_0001>

<bundles_post_ra>
// kernel: neural_network_forward.1
= control target key start
LH: loop header
LB: loop body
LE: loop exit
PB: predicated region body
PF: predicated region fallthrough
CT: control target
= control target key end

     0   :  { %12 = vsyncpa [#allocation3], 0  ;;  %s5102_s0 = inlined_call_operand.vmem [shape: f32[8,784], index: 0, kind: input, shape index: {}]   ;;  %s5103_s1 = inlined_call_operand.hbm [shape: bf16[784,512], index: 1, kind: input, shape index: {}]   ;;  %s5104_s2 = inlined_call_operand.vmem [shape: f32[1,512], index: 2, kind: input, shape index: {}]   ;;  %s5105_s3 = inlined_call_operand.hbm [shape: bf16[512,512], index: 3, kind: input, shape index: {}]   ;;  %s5106_s4 = inlined_call_operand.vmem [shape: f32[1,512], index: 4, kind: input, shape index: {}]   ;;  %s5107_s5 = inlined_call_operand.vmem [shape: bf16[512,128], index: 5, kind: input, shape index: {}]   ;;  %s5108_s6 = inlined_call_operand.vmem [shape: f32[1,128], index: 6, kind: input, shape index: {}]   ;;  %s5109_s7 = inlined_call_operand.vmem [shape: bf16[8,128], index: 7, kind: output, shape index: {}]  }
   0x1   :  { %s20_s26 = sshll.u32 %s5103_s1, 4  ;;  %s21_s26 = int_to_ptr.hbm [resolvable:$true] %s20_s26 }
   0x2   :  { %13 = vsyncpa [#allocation5], 0  ;;  %s4790_s27 = smov [#allocation2]   ;;  %s35_s8 = sshll.u32 %s5105_s3, 4  ;;  %s36_s8 = int_to_ptr.hbm [resolvable:$true] %s35_s8 }
   0x3   :  { %s22_s28 = sshll.u32 %s4790_s27, 4  ;;  %s4791_s9 = smov 256   ;;  %s23_s28 = int_to_ptr.vmem [resolvable:$true] %s22_s28 }
   0x4   :  { %s4792_s10 = smov 16   ;;  %s4793_s11 = smov [#allocation4]  }
   0x5   :  { %28 = dma.hbm_to_vmem [thread:$0]  %s21_s26, 25088, %s23_s28, [#allocation3], %s4791_s9, %s4791_s9, %s4792_s10  }
   0x6   :  { %s37_s12 = sshll.u32 %s4793_s11, 4  ;;  %s38_s12 = int_to_ptr.vmem [resolvable:$true] %s37_s12 }
   0x7   :  { %43 = dma.hbm_to_vmem [thread:$0]  %s36_s8, 16384, %s38_s12, [#allocation5], %s4791_s9, %s4791_s9, %s4792_s10  }
   0x8   :  { %4786 = dma.done.wait [#allocation3], 25088  }
   0x9   :  { %4787 = vsyncadd [#allocation3], 4294942208 }
   0xa   :  { %4788 = dma.done.wait [#allocation5], 16384  }
   0xb   :  { %4789 = vsyncadd [#allocation5], 4294950912  ;;  %v3063_v0 = vld [vmem:[#allocation2 + $0xe0] sm:$0xf]  ;;  %v4407_v1 = vld [vmem:[#allocation2 + $0xec] sm:$0xf0] }
   0xc   :  { %v3191_v2 = vld [vmem:[#allocation2 + $0x1e0] sm:$0xf]  ;;  %v3064_v3 = vor.u32 %v4407_v1, %v3063_v0  ;;  %v4439_v4 = vld [vmem:[#allocation2 + $0x1ec] sm:$0xf0]  ;;  %vm1259_vm0 = vcmask 130048  }
   0xd   :  { %v3319_v5 = vld [vmem:[#allocation2 + $0x2e0] sm:$0xf]  ;;  %v4471_v6 = vld [vmem:[#allocation2 + $0x2ec] sm:$0xf0]  ;;  %v3192_v7 = vor.u32 %v4439_v4, %v3191_v2 }
   0xe   :  { %v3320_v8 = vor.u32 %v4471_v6, %v3319_v5  ;;  %v3447_v9 = vld [vmem:[#allocation2 + $0x3e0] sm:$0xf]  ;;  %v4503_v10 = vld [vmem:[#allocation2 + $0x3ec] sm:$0xf0]  ;;  %1263 = vmatpush.bf16.msra.mxu0 %v3064_v3 }
   0xf   :  { %v3047_v11 = vld [vmem:[#allocation2 + $0xc0] sm:$0xf]  ;;  %v3448_v12 = vor.u32 %v4503_v10, %v3447_v9  ;;  %v4403_v13 = vld [vmem:[#allocation2 + $0xcc] sm:$0xf0]  ;;  %1276 = vmatpush.bf16.msra.mxu1 %v3192_v7 }
  0x10   :  { %v3175_v14 = vld [vmem:[#allocation2 + $0x1c0] sm:$0xf]  ;;  %v4435_v15 = vld [vmem:[#allocation2 + $0x1cc] sm:$0xf0]  ;;  %1289 = vmatpush.bf16.msra.mxu2 %v3320_v8  ;;  %v3048_v16 = vor.u32 %v4403_v13, %v3047_v11 }
  0x11   :  { %v3176_v17 = vor.u32 %v4435_v15, %v3175_v14  ;;  %v3303_v18 = vld [vmem:[#allocation2 + $0x2c0] sm:$0xf]  ;;  %v4467_v19 = vld [vmem:[#allocation2 + $0x2cc] sm:$0xf0]  ;;  %1302 = vmatpush.bf16.msra.mxu3 %v3448_v12 }
  0x12   :  { %v3431_v20 = vld [vmem:[#allocation2 + $0x3c0] sm:$0xf]  ;;  %v3304_v21 = vor.u32 %v4467_v19, %v3303_v18  ;;  %v4499_v22 = vld [vmem:[#allocation2 + $0x3cc] sm:$0xf0]  ;;  %1264 = vmatpush.bf16.msra.mxu0 %v3048_v16 }
  0x13   :  { %v3031_v23 = vld [vmem:[#allocation2 + $0xa0] sm:$0xf]  ;;  %v4399_v24 = vld [vmem:[#allocation2 + $0xac] sm:$0xf0]  ;;  %v3432_v25 = vor.u32 %v4499_v22, %v3431_v20  ;;  %1277 = vmatpush.bf16.msra.mxu1 %v3176_v17 }
  0x14   :  { %v3159_v26 = vld [vmem:[#allocation2 + $0x1a0] sm:$0xf]  ;;  %v4431_v27 = vld [vmem:[#allocation2 + $0x1ac] sm:$0xf0]  ;;  %v3032_v29 = vor.u32 %v4399_v24, %v3031_v23  ;;  %1290 = vmatpush.bf16.msra.mxu2 %v3304_v21 }
  0x15   :  { %v3287_v28 = vld [vmem:[#allocation2 + $0x2a0] sm:$0xf]  ;;  %v4463_v30 = vld [vmem:[#allocation2 + $0x2ac] sm:$0xf0]  ;;  %v3160_v33 = vor.u32 %v4431_v27, %v3159_v26  ;;  %1303 = vmatpush.bf16.msra.mxu3 %v3432_v25 }
  0x16   :  { %v3415_v31 = vld [vmem:[#allocation2 + $0x3a0] sm:$0xf]  ;;  %v4495_v32 = vld [vmem:[#allocation2 + $0x3ac] sm:$0xf0]  ;;  %v3288_v34 = vor.u32 %v4463_v30, %v3287_v28  ;;  %1265 = vmatpush.bf16.msra.mxu0 %v3032_v29 }
  0x17   :  { %v3015_v35 = vld [vmem:[#allocation2 + $0x80] sm:$0xf]  ;;  %v4395_v36 = vld [vmem:[#allocation2 + $0x8c] sm:$0xf0]  ;;  %v3416_v38 = vor.u32 %v4495_v32, %v3415_v31  ;;  %1278 = vmatpush.bf16.msra.mxu1 %v3160_v33  ;;  %v4405_v33 = vld [vmem:[#allocation2 + $0xe4] sm:$0xf] }
  0x18   :  { %v3143_v37 = vld [vmem:[#allocation2 + $0x180] sm:$0xf]  ;;  %v4427_v39 = vld [vmem:[#allocation2 + $0x18c] sm:$0xf0]  ;;  %v3016_v44 = vor.u32 %v4395_v36, %v3015_v35  ;;  %1291 = vmatpush.bf16.msra.mxu2 %v3288_v34  ;;  %v3065_v34 = vld [vmem:[#allocation2 + $0xf0] sm:$0xf0] }
  0x19   :  { %v3271_v40 = vld [vmem:[#allocation2 + $0x280] sm:$0xf]  ;;  %v4459_v41 = vld [vmem:[#allocation2 + $0x28c] sm:$0xf0]  ;;  %v3144_v45 = vor.u32 %v4427_v39, %v3143_v37  ;;  %1304 = vmatpush.bf16.msra.mxu3 %v3416_v38 }
  0x1a   :  { %v3399_v42 = vld [vmem:[#allocation2 + $0x380] sm:$0xf]  ;;  %v4491_v43 = vld [vmem:[#allocation2 + $0x38c] sm:$0xf0]  ;;  %v3272_v46 = vor.u32 %v4459_v41, %v3271_v40  ;;  %1266 = vmatpush.bf16.msra.mxu0 %v3016_v44  ;;  %v3193_v44 = vld [vmem:[#allocation2 + $0x1f0] sm:$0xf0] }
  0x1b   :  { %v2999_v47 = vld [vmem:[#allocation2 + $0x60] sm:$0xf]  ;;  %v4391_v48 = vld [vmem:[#allocation2 + $0x6c] sm:$0xf0]  ;;  %v3400_v50 = vor.u32 %v4491_v43, %v3399_v42  ;;  %1279 = vmatpush.bf16.msra.mxu1 %v3144_v45  ;;  %v4437_v43 = vld [vmem:[#allocation2 + $0x1e4] sm:$0xf] }
  0x1c   :  { %v3127_v49 = vld [vmem:[#allocation2 + $0x160] sm:$0xf]  ;;  %v4423_v51 = vld [vmem:[#allocation2 + $0x16c] sm:$0xf0]  ;;  %v3000_v56 = vor.u32 %v4391_v48, %v2999_v47  ;;  %1292 = vmatpush.bf16.msra.mxu2 %v3272_v46  ;;  %v62_v45 = vld [vmem:[%s5102_s0 + $0x18] sm:$0xff]  ;;  %v3068_v47 = vor.u32 %v4405_v33, %v3065_v34 }
  0x1d   :  { %v3255_v52 = vld [vmem:[#allocation2 + $0x260] sm:$0xf]  ;;  %v4455_v53 = vld [vmem:[#allocation2 + $0x26c] sm:$0xf0]  ;;  %v3128_v57 = vor.u32 %v4423_v51, %v3127_v49  ;;  %1305 = vmatpush.bf16.msra.mxu3 %v3400_v50 }
  0x1e   :  { %v3383_v54 = vld [vmem:[#allocation2 + $0x360] sm:$0xf]  ;;  %v4487_v55 = vld [vmem:[#allocation2 + $0x36c] sm:$0xf0]  ;;  %v3256_v58 = vor.u32 %v4455_v53, %v3255_v52  ;;  %1267 = vmatpush.bf16.msra.mxu0 %v3000_v56  ;;  %v4401_v53 = vld [vmem:[#allocation2 + $0xc4] sm:$0xf] }
  0x1f   :  { %v2983_v59 = vld [vmem:[#allocation2 + $0x40] sm:$0xf]  ;;  %v4387_v60 = vld [vmem:[#allocation2 + $0x4c] sm:$0xf0]  ;;  %v3384_v62 = vor.u32 %v4487_v55, %v3383_v54  ;;  %1280 = vmatpush.bf16.msra.mxu1 %v3128_v57  ;;  %v3049_v54 = vld [vmem:[#allocation2 + $0xd0] sm:$0xf0]  ;;  %v4853_v57 = vpack.c.bf16 %v62_v45, %v62_v45 }
  0x20   :  { %v3111_v61 = vld [vmem:[#allocation2 + $0x140] sm:$0xf]  ;;  %v4419_v63 = vld [vmem:[#allocation2 + $0x14c] sm:$0xf0]  ;;  %v2984_v4 = vor.u32 %v4387_v60, %v2983_v59  ;;  %1293 = vmatpush.bf16.msra.mxu2 %v3256_v58  ;;  %v60_v58 = vld [vmem:[%s5102_s0 + $0x8] sm:$0xff]  ;;  %v3196_v59 = vor.u32 %v4437_v43, %v3193_v44 }
  0x21   :  { %v3239_v0 = vld [vmem:[#allocation2 + $0x240] sm:$0xf]  ;;  %v4451_v1 = vld [vmem:[#allocation2 + $0x24c] sm:$0xf0]  ;;  %v3112_v5 = vor.u32 %v4419_v63, %v3111_v61  ;;  %1306 = vmatpush.bf16.msra.mxu3 %v3384_v62  ;;  %v4433_v61 = vld [vmem:[#allocation2 + $0x1c4] sm:$0xf] }
  0x22   :  { %v3367_v2 = vld [vmem:[#allocation2 + $0x340] sm:$0xf]  ;;  %v4483_v3 = vld [vmem:[#allocation2 + $0x34c] sm:$0xf0]  ;;  %v3240_v6 = vor.u32 %v4451_v1, %v3239_v0  ;;  %1268 = vmatpush.bf16.msra.mxu0 %v2984_v4  ;;  %v3177_v62 = vld [vmem:[#allocation2 + $0x1d0] sm:$0xf0]  ;;  %v3052_v0 = vor.u32 %v4401_v53, %v3049_v54 }
  0x23   :  { %v2967_v7 = vld [vmem:[#allocation2 + $0x20] sm:$0xf]  ;;  %v4383_v8 = vld [vmem:[#allocation2 + $0x2c] sm:$0xf0]  ;;  %v3368_v10 = vor.u32 %v4483_v3, %v3367_v2  ;;  %1281 = vmatpush.bf16.msra.mxu1 %v3112_v5  ;;  %v4397_v5 = vld [vmem:[#allocation2 + $0xa4] sm:$0xf] }
  0x24   :  { %v3095_v9 = vld [vmem:[#allocation2 + $0x120] sm:$0xf]  ;;  %v4415_v11 = vld [vmem:[#allocation2 + $0x12c] sm:$0xf0]  ;;  %v2968_v16 = vor.u32 %v4383_v8, %v2967_v7  ;;  %1294 = vmatpush.bf16.msra.mxu2 %v3240_v6  ;;  %v3033_v6 = vld [vmem:[#allocation2 + $0xb0] sm:$0xf0]  ;;  %v4860_v7 = vpack.c.bf16 %v60_v58, %v60_v58  ;;  %v3180_v8 = vor.u32 %v4433_v61, %v3177_v62 }
  0x25   :  { %v3223_v12 = vld [vmem:[#allocation2 + $0x220] sm:$0xf]  ;;  %v4447_v13 = vld [vmem:[#allocation2 + $0x22c] sm:$0xf0]  ;;  %v3096_v20 = vor.u32 %v4415_v11, %v3095_v9  ;;  %1307 = vmatpush.bf16.msra.mxu3 %v3368_v10  ;;  %v4429_v10 = vld [vmem:[#allocation2 + $0x1a4] sm:$0xf] }
  0x26   :  { %v3351_v14 = vld [vmem:[#allocation2 + $0x320] sm:$0xf]  ;;  %v4479_v15 = vld [vmem:[#allocation2 + $0x32c] sm:$0xf0]  ;;  %v3224_v21 = vor.u32 %v4447_v13, %v3223_v12  ;;  %1269 = vmatpush.bf16.msra.mxu0 %v2968_v16  ;;  %v3161_v11 = vld [vmem:[#allocation2 + $0x1b0] sm:$0xf0]  ;;  %v3036_v13 = vor.u32 %v4397_v5, %v3033_v6 }
  0x27   :  { %v2951_v17 = vld [vmem:[#allocation2] sm:$0xf]  ;;  %v4379_v18 = vld [vmem:[#allocation2 + $0xc] sm:$0xf0]  ;;  %v3352_v25 = vor.u32 %v4479_v15, %v3351_v14  ;;  %1282 = vmatpush.bf16.msra.mxu1 %v3096_v20  ;;  %v3164_v20 = vor.u32 %v4429_v10, %v3161_v11  ;;  %v4385_v43 = vld [vmem:[#allocation2 + $0x44] sm:$0xf] }
  0x28   :  { %v3079_v19 = vld [vmem:[#allocation2 + $0x100] sm:$0xf]  ;;  %v4411_v22 = vld [vmem:[#allocation2 + $0x10c] sm:$0xf0]  ;;  %v2952_v32 = vor.u32 %v4379_v18, %v2951_v17  ;;  %1295 = vmatpush.bf16.msra.mxu2 %v3224_v21  ;;  %v4393_v18 = vld [vmem:[#allocation2 + $0x84] sm:$0xf] }
  0x29   :  { %v3207_v23 = vld [vmem:[#allocation2 + $0x200] sm:$0xf]  ;;  %v4443_v24 = vld [vmem:[#allocation2 + $0x20c] sm:$0xf0]  ;;  %v3080_v36 = vor.u32 %v4411_v22, %v3079_v19  ;;  %1308 = vmatpush.bf16.msra.mxu3 %v3352_v25  ;;  %v3017_v19 = vld [vmem:[#allocation2 + $0x90] sm:$0xf0] }
  0x2a   :  { %v3335_v26 = vld [vmem:[#allocation2 + $0x300] sm:$0xf]  ;;  %v4475_v27 = vld [vmem:[#allocation2 + $0x30c] sm:$0xf0]  ;;  %v3208_v37 = vor.u32 %v4443_v24, %v3207_v23  ;;  %1270 = vmatpush.bf16.msra.mxu0 %v2952_v32  ;;  %v4425_v22 = vld [vmem:[#allocation2 + $0x184] sm:$0xf]  ;;  %v3020_v25 = vor.u32 %v4393_v18, %v3017_v19 }
  0x2b   :  { %v3575_v28 = vld [vmem:[#allocation2 + $0x4e0] sm:$0xf]  ;;  %v4535_v29 = vld [vmem:[#allocation2 + $0x4ec] sm:$0xf0]  ;;  %v3336_v41 = vor.u32 %v4475_v27, %v3335_v26  ;;  %1283 = vmatpush.bf16.msra.mxu1 %v3080_v36  ;;  %v3145_v23 = vld [vmem:[#allocation2 + $0x190] sm:$0xf0] }
  0x2c   :  { %v3703_v30 = vld [vmem:[#allocation2 + $0x5e0] sm:$0xf]  ;;  %v4567_v31 = vld [vmem:[#allocation2 + $0x5ec] sm:$0xf0]  ;;  %v3576_v42 = vor.u32 %v4535_v29, %v3575_v28  ;;  %1296 = vmatpush.bf16.msra.mxu2 %v3208_v37  ;;  %v3148_v33 = vor.u32 %v4425_v22, %v3145_v23  ;;  %v3129_v36 = vld [vmem:[#allocation2 + $0x170] sm:$0xf0] }
  0x2d   :  { %v61_v35 = vld [vmem:[%s5102_s0 + $0x10] sm:$0xff]  ;;  %v3719_v38 = vld [vmem:[#allocation2 + $0x600] sm:$0xf]  ;;  %v3704_v46 = vor.u32 %v4567_v31, %v3703_v30  ;;  %1309 = vmatpush.bf16.msra.mxu3 %v3336_v41  ;;  %v4389_v30 = vld [vmem:[#allocation2 + $0x64] sm:$0xf] }
  0x2e   :  { %v4571_v39 = vld [vmem:[#allocation2 + $0x60c] sm:$0xf0]  ;;  %v59_v40 = vld [vmem:[%s5102_s0] sm:$0xff]  ;;  %v4849_v51 = vpack.c.bf16 %v61_v35, %v61_v35  ;;  %1315 = vmatpush.bf16.msrb.mxu0 %v3576_v42  ;;  %1284 = vmatmul.bf16.vlgmr.msra.gmra.mxu1 %v4860_v7  ;;  %v3001_v31 = vld [vmem:[#allocation2 + $0x70] sm:$0xf0] }
  0x2f   :  { %v3559_v48 = vld [vmem:[#allocation2 + $0x4c0] sm:$0xf]  ;;  %v4531_v49 = vld [vmem:[#allocation2 + $0x4cc] sm:$0xf0]  ;;  %v4851_v55 = vpack.c.bf16 %v59_v40, %v59_v40  ;;  %v3720_v56 = vor.u32 %v4571_v39, %v3719_v38  ;;  %1328 = vmatpush.bf16.msrb.mxu1 %v3704_v46  ;;  %v4421_v35 = vld [vmem:[#allocation2 + $0x164] sm:$0xf]  ;;  %v3004_v38 = vor.u32 %v4389_v30, %v3001_v31 }
  0x30   :  { %v3687_v50 = vld [vmem:[#allocation2 + $0x5c0] sm:$0xf]  ;;  %v4563_v52 = vld [vmem:[#allocation2 + $0x5cc] sm:$0xf0]  ;;  %v3560_v60 = vor.u32 %v4531_v49, %v3559_v48  ;;  %1297 = vmatmul.bf16.vlgmr.msra.gmra.mxu2 %v4849_v51  ;;  %1310 = vmatmul.bf16.vlgmr.msra.gmra.mxu3 %v4853_v57  ;;  %v2985_v44 = vld [vmem:[#allocation2 + $0x50] sm:$0xf0]  ;;  %v3132_v46 = vor.u32 %v4421_v35, %v3129_v36 }
  0x31   :  { %1354 = vmatpush.bf16.msrb.mxu3 %v3068_v47  ;;  %v3688_v63 = vor.u32 %v4563_v52, %v3687_v50  ;;  %v3543_v1 = vld [vmem:[#allocation2 + $0x4a0] sm:$0xf]  ;;  %v4527_v2 = vld [vmem:[#allocation2 + $0x4ac] sm:$0xf0]  ;;  %1271 = vmatmul.bf16.vlgmr.msra.gmra.mxu0 %v4851_v55  ;;  %v4417_v48 = vld [vmem:[#allocation2 + $0x144] sm:$0xf]  ;;  %v2988_v52 = vor.u32 %v4385_v43, %v2985_v44 }
  0x32   :  { %v3671_v3 = vld [vmem:[#allocation2 + $0x5a0] sm:$0xf]  ;;  %v4559_v4 = vld [vmem:[#allocation2 + $0x5ac] sm:$0xf0]  ;;  %1348 = vmatpush.bf16.msrb.mxu2 %v3720_v56  ;;  %1316 = vmatpush.bf16.msrb.mxu0 %v3560_v60  ;;  %v3544_v9 = vor.u32 %v4527_v2, %v3543_v1  ;;  %v3113_v49 = vld [vmem:[#allocation2 + $0x150] sm:$0xf0] }
  0x33   :  { %1329 = vmatpush.bf16.msrb.mxu1 %v3688_v63  ;;  %v3672_v12 = vor.u32 %v4559_v4, %v3671_v3  ;;  %v3527_v14 = vld [vmem:[#allocation2 + $0x480] sm:$0xf]  ;;  %v4523_v15 = vld [vmem:[#allocation2 + $0x48c] sm:$0xf0]  ;;  %v2969_v60 = vld [vmem:[#allocation2 + $0x30] sm:$0xf0]  ;;  %v3116_v61 = vor.u32 %v4417_v48, %v3113_v49 }
  0x34   :  { %v3655_v16 = vld [vmem:[#allocation2 + $0x580] sm:$0xf]  ;;  %v4555_v17 = vld [vmem:[#allocation2 + $0x58c] sm:$0xf0]  ;;  %v3528_v21 = vor.u32 %v4523_v15, %v3527_v14  ;;  %v4413_v63 = vld [vmem:[#allocation2 + $0x124] sm:$0xf] }
  0x35   :  { %1355 = vmatpush.bf16.msrb.mxu3 %v3052_v0  ;;  %v3656_v24 = vor.u32 %v4555_v17, %v3655_v16  ;;  %v3511_v26 = vld [vmem:[#allocation2 + $0x460] sm:$0xf]  ;;  %v4519_v27 = vld [vmem:[#allocation2 + $0x46c] sm:$0xf0]  ;;  %v3097_v0 = vld [vmem:[#allocation2 + $0x130] sm:$0xf0] }
  0x36   :  { %1367 = vmatpush.bf16.msra.mxu2 %v3196_v59  ;;  %1317 = vmatpush.bf16.msrb.mxu0 %v3544_v9  ;;  %v3639_v28 = vld [vmem:[#allocation2 + $0x560] sm:$0xf]  ;;  %v4551_v29 = vld [vmem:[#allocation2 + $0x56c] sm:$0xf0]  ;;  %v3512_v34 = vor.u32 %v4519_v27, %v3511_v26  ;;  %v4381_v59 = vld [vmem:[#allocation2 + $0x24] sm:$0xf]  ;;  %v3100_v14 = vor.u32 %v4413_v63, %v3097_v0 }
  0x37   :  { %1330 = vmatpush.bf16.msrb.mxu1 %v3672_v12  ;;  %v65_v32 = vld [vmem:[%s5102_s0 + $0x30] sm:$0xff]  ;;  %v3640_v37 = vor.u32 %v4551_v29, %v3639_v28  ;;  %v3495_v39 = vld [vmem:[#allocation2 + $0x440] sm:$0xf]  ;;  %v2972_v3 = vor.u32 %v4381_v59, %v2969_v60  ;;  %v4469_v10 = vld [vmem:[#allocation2 + $0x2e4] sm:$0xf] }
  0x38   :  { %v4515_v40 = vld [vmem:[#allocation2 + $0x44c] sm:$0xf0]  ;;  %v3623_v41 = vld [vmem:[#allocation2 + $0x540] sm:$0xf]  ;;  %v4867_v45 = vpack.c.bf16 %v65_v32, %v65_v32  ;;  %v2953_v9 = vld [vmem:[#allocation2 + $0x10] sm:$0xf0] }
  0x39   :  { %1356 = vmatpush.bf16.msrb.mxu3 %v3036_v13  ;;  %v4547_v42 = vld [vmem:[#allocation2 + $0x54c] sm:$0xf0]  ;;  %v3496_v47 = vor.u32 %v4515_v40, %v3495_v39  ;;  %v3479_v53 = vld [vmem:[#allocation2 + $0x420] sm:$0xf]  ;;  %v3321_v11 = vld [vmem:[#allocation2 + $0x2f0] sm:$0xf0] }
  0x3a   :  { %1368 = vmatpush.bf16.msra.mxu2 %v3180_v8  ;;  %1318 = vmatpush.bf16.msrb.mxu0 %v3528_v21  ;;  %v3624_v50 = vor.u32 %v4547_v42, %v3623_v41  ;;  %v4511_v54 = vld [vmem:[#allocation2 + $0x42c] sm:$0xf0]  ;;  %v3607_v56 = vld [vmem:[#allocation2 + $0x520] sm:$0xf]  ;;  %v4377_v8 = vld [vmem:[#allocation2 + $0x4] sm:$0xf] }
  0x3b   :  { %1331 = vmatpush.bf16.msrb.mxu1 %v3656_v24  ;;  %v4543_v58 = vld [vmem:[#allocation2 + $0x52c] sm:$0xf0]  ;;  %v3480_v62 = vor.u32 %v4511_v54, %v3479_v53  ;;  %v3463_v1 = vld [vmem:[#allocation2 + $0x400] sm:$0xf]  ;;  %v4501_v12 = vld [vmem:[#allocation2 + $0x3e4] sm:$0xf]  ;;  %v3324_v24 = vor.u32 %v4469_v10, %v3321_v11 }
  0x3c   :  { %v3608_v2 = vor.u32 %v4543_v58, %v3607_v56  ;;  %v4507_v4 = vld [vmem:[#allocation2 + $0x40c] sm:$0xf0]  ;;  %v3591_v5 = vld [vmem:[#allocation2 + $0x500] sm:$0xf]  ;;  %v3449_v13 = vld [vmem:[#allocation2 + $0x3f0] sm:$0xf0] }
  0x3d   :  { %1357 = vmatpush.bf16.msrb.mxu3 %v3020_v25  ;;  %v4539_v6 = vld [vmem:[#allocation2 + $0x50c] sm:$0xf0]  ;;  %v3464_v15 = vor.u32 %v4507_v4, %v3463_v1  ;;  %v4533_v16 = vld [vmem:[#allocation2 + $0x4e4] sm:$0xf]  ;;  %v3577_v17 = vld [vmem:[#allocation2 + $0x4f0] sm:$0xf0]  ;;  %v3452_v25 = vor.u32 %v4501_v12, %v3449_v13 }
  0x3e   :  { %1369 = vmatpush.bf16.msra.mxu2 %v3164_v20  ;;  %1319 = vmatpush.bf16.msrb.mxu0 %v3512_v34  ;;  %v63_v18 = vld [vmem:[%s5102_s0 + $0x20] sm:$0xff]  ;;  %v3592_v19 = vor.u32 %v4539_v6, %v3591_v5  ;;  %v2956_v20 = vor.u32 %v4377_v8, %v2953_v9  ;;  %v3081_v22 = vld [vmem:[#allocation2 + $0x110] sm:$0xf0]  ;;  %v64_v23 = vld [vmem:[%s5102_s0 + $0x28] sm:$0xff]  ;;  %v3580_v29 = vor.u32 %v4533_v16, %v3577_v17 }
  0x3f   :  { %1332 = vmatpush.bf16.msrb.mxu1 %v3640_v37  ;;  %v4409_v21 = vld [vmem:[#allocation2 + $0x104] sm:$0xf]  ;;  %v3705_v27 = vld [vmem:[#allocation2 + $0x5f0] sm:$0xf0]  ;;  %v4877_v30 = vpack.c.bf16 %v63_v18, %v63_v18  ;;  %v4879_v35 = vpack.c.bf16 %v64_v23, %v64_v23 }
  0x40   :  { %3733 = vmatmul.msk.bf16.vlgmr.msrb.gmra.mxu2 %vm1259_vm0, %v4867_v45  ;;  %v4565_v26 = vld [vmem:[#allocation2 + $0x5e4] sm:$0xf]  ;;  %v3305_v31 = vld [vmem:[#allocation2 + $0x2d0] sm:$0xf0]  ;;  %v3084_v34 = vor.u32 %v4409_v21, %v3081_v22 }
  0x41   :  { %1358 = vmatpush.bf16.msrb.mxu3 %v3004_v38  ;;  %v4465_v28 = vld [vmem:[#allocation2 + $0x2c4] sm:$0xf]  ;;  %v3561_v37 = vld [vmem:[#allocation2 + $0x4d0] sm:$0xf0]  ;;  %v3708_v38 = vor.u32 %v4565_v26, %v3705_v27 }
  0x42   :  { %1370 = vmatpush.bf16.msra.mxu2 %v3148_v33  ;;  %1320 = vmatpush.bf16.msrb.mxu0 %v3496_v47  ;;  %v4497_v32 = vld [vmem:[#allocation2 + $0x3c4] sm:$0xf]  ;;  %v3433_v33 = vld [vmem:[#allocation2 + $0x3d0] sm:$0xf0]  ;;  %v3308_v39 = vor.u32 %v4465_v28, %v3305_v31 }
  0x43   :  { %1333 = vmatpush.bf16.msrb.mxu1 %v3624_v50  ;;  %v4529_v36 = vld [vmem:[#allocation2 + $0x4c4] sm:$0xf]  ;;  %v3436_v40 = vor.u32 %v4497_v32, %v3433_v33  ;;  %v3689_v42 = vld [vmem:[#allocation2 + $0x5d0] sm:$0xf0] }
  0x44   :  { %v4561_v41 = vld [vmem:[#allocation2 + $0x5c4] sm:$0xf]  ;;  %v3564_v44 = vor.u32 %v4529_v36, %v3561_v37  ;;  %v3417_v48 = vld [vmem:[#allocation2 + $0x3b0] sm:$0xf0] }
  0x45   :  { %1359 = vmatpush.bf16.msrb.mxu3 %v2988_v52  ;;  %v4461_v43 = vld [vmem:[#allocation2 + $0x2a4] sm:$0xf]  ;;  %v3545_v50 = vld [vmem:[#allocation2 + $0x4b0] sm:$0xf0]  ;;  %v3692_v52 = vor.u32 %v4561_v41, %v3689_v42 }
  0x46   :  { %1371 = vmatpush.bf16.msra.mxu2 %v3132_v46  ;;  %1321 = vmatpush.bf16.msrb.mxu0 %v3480_v62  ;;  %v3289_v46 = vld [vmem:[#allocation2 + $0x2b0] sm:$0xf0]  ;;  %v4493_v47 = vld [vmem:[#allocation2 + $0x3a4] sm:$0xf] }
  0x47   :  { %1334 = vmatpush.bf16.msrb.mxu1 %v3608_v2  ;;  %v4525_v49 = vld [vmem:[#allocation2 + $0x4a4] sm:$0xf]  ;;  %v3292_v53 = vor.u32 %v4461_v43, %v3289_v46  ;;  %v3420_v54 = vor.u32 %v4493_v47, %v3417_v48  ;;  %v3673_v58 = vld [vmem:[#allocation2 + $0x5b0] sm:$0xf0] }
  0x48   :  { %v4557_v56 = vld [vmem:[#allocation2 + $0x5a4] sm:$0xf]  ;;  %v3548_v60 = vor.u32 %v4525_v49, %v3545_v50  ;;  %v3401_v63 = vld [vmem:[#allocation2 + $0x390] sm:$0xf0] }
  0x49   :  { %1360 = vmatpush.bf16.msrb.mxu3 %v2972_v3  ;;  %v4457_v59 = vld [vmem:[#allocation2 + $0x284] sm:$0xf]  ;;  %v3529_v1 = vld [vmem:[#allocation2 + $0x490] sm:$0xf0]  ;;  %v3676_v2 = vor.u32 %v4557_v56, %v3673_v58  ;;  %v3071_v56 = vld [vmem:[#allocation2 + $0xe8] sm:$0xf] }
  0x4a   :  { %1372 = vmatpush.bf16.msra.mxu2 %v3116_v61  ;;  %1322 = vmatpush.bf16.msrb.mxu0 %v3464_v15  ;;  %v3273_v61 = vld [vmem:[#allocation2 + $0x290] sm:$0xf0]  ;;  %v4489_v62 = vld [vmem:[#allocation2 + $0x384] sm:$0xf]  ;;  %v4408_v58 = vld [vmem:[#allocation2 + $0xf4] sm:$0xf0] }
  0x4b   :  { %1335 = vmatpush.bf16.msrb.mxu1 %v3592_v19  ;;  %v4521_v0 = vld [vmem:[#allocation2 + $0x484] sm:$0xf]  ;;  %v3276_v3 = vor.u32 %v4457_v59, %v3273_v61  ;;  %v3404_v4 = vor.u32 %v4489_v62, %v3401_v63  ;;  %v3657_v6 = vld [vmem:[#allocation2 + $0x590] sm:$0xf0]  ;;  %v3327_v62 = vld [vmem:[#allocation2 + $0x2e8] sm:$0xf] }
  0x4c   :  { %v4553_v5 = vld [vmem:[#allocation2 + $0x584] sm:$0xf]  ;;  %v3532_v9 = vor.u32 %v4521_v0, %v3529_v1  ;;  %v3257_v10 = vld [vmem:[#allocation2 + $0x270] sm:$0xf0]  ;;  %v4472_v63 = vld [vmem:[#allocation2 + $0x2f4] sm:$0xf0] }
  0x4d   :  { %1361 = vmatpush.bf16.msrb.mxu3 %v2956_v20  ;;  %1323 = vmatmul.bf16.vlgmr.msrb.gmra.mxu0 %v4877_v30  ;;  %v4453_v8 = vld [vmem:[#allocation2 + $0x264] sm:$0xf]  ;;  %v3385_v12 = vld [vmem:[#allocation2 + $0x370] sm:$0xf0]  ;;  %v3660_v15 = vor.u32 %v4553_v5, %v3657_v6  ;;  %v3072_v5 = vor.u32 %v4408_v58, %v3071_v56  ;;  %v3455_v6 = vld [vmem:[#allocation2 + $0x3e8] sm:$0xf] }
  0x4e   :  { %1373 = vmatpush.bf16.msra.mxu2 %v3100_v14  ;;  %1380 = vmatpush.bf16.msra.mxu0 %v3324_v24  ;;  %v4485_v11 = vld [vmem:[#allocation2 + $0x364] sm:$0xf]  ;;  %v3513_v14 = vld [vmem:[#allocation2 + $0x470] sm:$0xf0]  ;;  %v3260_v16 = vor.u32 %v4453_v8, %v3257_v10  ;;  %v4504_v8 = vld [vmem:[#allocation2 + $0x3f4] sm:$0xf0] }
  0x4f   :  { %1393 = vmatpush.bf16.msra.mxu1 %v3452_v25  ;;  %v4517_v13 = vld [vmem:[#allocation2 + $0x464] sm:$0xf]  ;;  %v3388_v17 = vor.u32 %v4485_v11, %v3385_v12  ;;  %v3641_v19 = vld [vmem:[#allocation2 + $0x570] sm:$0xf0]  ;;  %v3199_v10 = vld [vmem:[#allocation2 + $0x1e8] sm:$0xf]  ;;  %v3328_v12 = vor.u32 %v4472_v63, %v3327_v62 }
  0x50   :  { %1336 = vmatmul.bf16.vlgmr.msrb.gmra.mxu1 %v4879_v35  ;;  %1362 = vmatmul.bf16.vlgmr.msrb.gmra.mxu3 %v4851_v55  ;;  %v4549_v18 = vld [vmem:[#allocation2 + $0x564] sm:$0xf]  ;;  %v3516_v21 = vor.u32 %v4517_v13, %v3513_v14  ;;  %v3241_v22 = vld [vmem:[#allocation2 + $0x250] sm:$0xf0]  ;;  %v4440_v11 = vld [vmem:[#allocation2 + $0x1f4] sm:$0xf0] }
  0x51   :  { %1406 = vmatpush.bf16.msra.mxu3 %v3580_v29  ;;  %v4449_v20 = vld [vmem:[#allocation2 + $0x244] sm:$0xf]  ;;  %v3369_v24 = vld [vmem:[#allocation2 + $0x350] sm:$0xf0]  ;;  %v3644_v27 = vor.u32 %v4549_v18, %v3641_v19  ;;  %v3055_v14 = vld [vmem:[#allocation2 + $0xc8] sm:$0xf]  ;;  %v3200_v19 = vor.u32 %v4440_v11, %v3199_v10 }
  0x52   :  { %1374 = vmatpush.bf16.msra.mxu2 %v3084_v34  ;;  %1381 = vmatpush.bf16.msra.mxu0 %v3308_v39  ;;  %v4481_v23 = vld [vmem:[#allocation2 + $0x344] sm:$0xf]  ;;  %v3497_v26 = vld [vmem:[#allocation2 + $0x450] sm:$0xf0]  ;;  %v3244_v28 = vor.u32 %v4449_v20, %v3241_v22  ;;  %v4468_v18 = vld [vmem:[#allocation2 + $0x2d4] sm:$0xf0] }
  0x53   :  { %1394 = vmatpush.bf16.msra.mxu1 %v3436_v40  ;;  %v4513_v25 = vld [vmem:[#allocation2 + $0x444] sm:$0xf]  ;;  %v3372_v29 = vor.u32 %v4481_v23, %v3369_v24  ;;  %v3625_v32 = vld [vmem:[#allocation2 + $0x550] sm:$0xf0]  ;;  %v3439_v20 = vld [vmem:[#allocation2 + $0x3c8] sm:$0xf] }
  0x54   :  { %v4545_v31 = vld [vmem:[#allocation2 + $0x544] sm:$0xf]  ;;  %v3500_v34 = vor.u32 %v4513_v25, %v3497_v26  ;;  %v3225_v36 = vld [vmem:[#allocation2 + $0x230] sm:$0xf0]  ;;  %v3183_v23 = vld [vmem:[#allocation2 + $0x1c8] sm:$0xf] }
  0x55   :  { %1407 = vmatpush.bf16.msra.mxu3 %v3564_v44  ;;  %1375 = vmatmul.bf16.vlgmr.msra.gmra.mxu2 %v4860_v7  ;;  %v4445_v33 = vld [vmem:[#allocation2 + $0x224] sm:$0xf]  ;;  %v3481_v40 = vld [vmem:[#allocation2 + $0x430] sm:$0xf0]  ;;  %v3628_v41 = vor.u32 %v4545_v31, %v3625_v32  ;;  %v4436_v24 = vld [vmem:[#allocation2 + $0x1d4] sm:$0xf0] }
  0x56   :  { %1419 = vmatpush.bf16.msrb.mxu2 %v3708_v38  ;;  %1382 = vmatpush.bf16.msra.mxu0 %v3292_v53  ;;  %v4477_v37 = vld [vmem:[#allocation2 + $0x324] sm:$0xf]  ;;  %v3353_v38 = vld [vmem:[#allocation2 + $0x330] sm:$0xf0]  ;;  %v3228_v46 = vor.u32 %v4445_v33, %v3225_v36  ;;  %v3039_v26 = vld [vmem:[#allocation2 + $0xa8] sm:$0xf]  ;;  %v3184_v32 = vor.u32 %v4436_v24, %v3183_v23 }
  0x57   :  { %1395 = vmatpush.bf16.msra.mxu1 %v3420_v54  ;;  %v4509_v39 = vld [vmem:[#allocation2 + $0x424] sm:$0xf]  ;;  %v3609_v43 = vld [vmem:[#allocation2 + $0x530] sm:$0xf0]  ;;  %v3356_v47 = vor.u32 %v4477_v37, %v3353_v38  ;;  %v4464_v31 = vld [vmem:[#allocation2 + $0x2b4] sm:$0xf0] }
  0x58   :  { %v4541_v42 = vld [vmem:[#allocation2 + $0x524] sm:$0xf]  ;;  %v3209_v48 = vld [vmem:[#allocation2 + $0x210] sm:$0xf0]  ;;  %v3423_v33 = vld [vmem:[#allocation2 + $0x3a8] sm:$0xf] }
  0x59   :  { %1408 = vmatpush.bf16.msra.mxu3 %v3548_v60  ;;  %v4441_v44 = vld [vmem:[#allocation2 + $0x204] sm:$0xf]  ;;  %v3337_v50 = vld [vmem:[#allocation2 + $0x310] sm:$0xf0]  ;;  %v3612_v60 = vor.u32 %v4541_v42, %v3609_v43  ;;  %v3167_v37 = vld [vmem:[#allocation2 + $0x1a8] sm:$0xf] }
  0x5a   :  { %1420 = vmatpush.bf16.msrb.mxu2 %v3692_v52  ;;  %1383 = vmatpush.bf16.msra.mxu0 %v3276_v3  ;;  %v4473_v49 = vld [vmem:[#allocation2 + $0x304] sm:$0xf]  ;;  %v3484_v52 = vor.u32 %v4509_v39, %v3481_v40  ;;  %v3465_v54 = vld [vmem:[#allocation2 + $0x410] sm:$0xf0]  ;;  %v3212_v0 = vor.u32 %v4441_v44, %v3209_v48  ;;  %v4432_v38 = vld [vmem:[#allocation2 + $0x1b4] sm:$0xf0] }
  0x5b   :  { %1396 = vmatpush.bf16.msra.mxu1 %v3404_v4  ;;  %v4505_v53 = vld [vmem:[#allocation2 + $0x404] sm:$0xf]  ;;  %v3721_v61 = vld [vmem:[#allocation2 + $0x610] sm:$0xf0]  ;;  %v3340_v1 = vor.u32 %v4473_v49, %v3337_v50  ;;  %v3023_v40 = vld [vmem:[#allocation2 + $0x88] sm:$0xf] }
  0x5c   :  { %v4569_v59 = vld [vmem:[#allocation2 + $0x604] sm:$0xf]  ;;  %v3593_v3 = vld [vmem:[#allocation2 + $0x510] sm:$0xf0]  ;;  %v3468_v4 = vor.u32 %v4505_v53, %v3465_v54  ;;  %v3279_v43 = vld [vmem:[#allocation2 + $0x288] sm:$0xf] }
  0x5d   :  { %1409 = vmatpush.bf16.msra.mxu3 %v3532_v9  ;;  %v3724_v9 = vor.u32 %v4569_v59, %v3721_v61  ;;  %v4460_v44 = vld [vmem:[#allocation2 + $0x294] sm:$0xf0]  ;;  %v3151_v50 = vld [vmem:[#allocation2 + $0x188] sm:$0xf] }
  0x5e   :  { %1421 = vmatpush.bf16.msrb.mxu2 %v3676_v2  ;;  %1384 = vmatpush.bf16.msra.mxu0 %v3260_v16  ;;  %v4537_v2 = vld [vmem:[#allocation2 + $0x504] sm:$0xf]  ;;  %v3456_v16 = vor.u32 %v4504_v8, %v3455_v6  ;;  %v4492_v48 = vld [vmem:[#allocation2 + $0x394] sm:$0xf0]  ;;  %v3280_v53 = vor.u32 %v4460_v44, %v3279_v43  ;;  %v3007_v54 = vld [vmem:[#allocation2 + $0x68] sm:$0xf] }
  0x5f   :  { %1397 = vmatpush.bf16.msra.mxu1 %v3388_v17  ;;  %v3596_v13 = vor.u32 %v4537_v2, %v3593_v3  ;;  %v3311_v17 = vld [vmem:[#allocation2 + $0x2c8] sm:$0xf]  ;;  %v4392_v56 = vld [vmem:[#allocation2 + $0x74] sm:$0xf0] }
  0x60   :  { %v3312_v25 = vor.u32 %v4468_v18, %v3311_v17  ;;  %v3263_v59 = vld [vmem:[#allocation2 + $0x268] sm:$0xf]  ;;  %v4488_v63 = vld [vmem:[#allocation2 + $0x374] sm:$0xf0] }
  0x61   :  { %1410 = vmatpush.bf16.msra.mxu3 %v3516_v21  ;;  %v4500_v21 = vld [vmem:[#allocation2 + $0x3d4] sm:$0xf0]  ;;  %v3391_v62 = vld [vmem:[#allocation2 + $0x368] sm:$0xf] }
  0x62   :  { %1422 = vmatpush.bf16.msrb.mxu2 %v3660_v15  ;;  %1385 = vmatpush.bf16.msra.mxu0 %v3244_v28  ;;  %v4404_v15 = vld [vmem:[#allocation2 + $0xd4] sm:$0xf0]  ;;  %v3440_v28 = vor.u32 %v4500_v21, %v3439_v20  ;;  %v3392_v6 = vor.u32 %v4488_v63, %v3391_v62  ;;  %v3247_v8 = vld [vmem:[#allocation2 + $0x248] sm:$0xf] }
  0x63   :  { %1398 = vmatpush.bf16.msra.mxu1 %v3372_v29  ;;  %v3056_v22 = vor.u32 %v4404_v15, %v3055_v14  ;;  %v3295_v29 = vld [vmem:[#allocation2 + $0x2a8] sm:$0xf]  ;;  %v4424_v2 = vld [vmem:[#allocation2 + $0x174] sm:$0xf0] }
  0x64   :  { %v3296_v39 = vor.u32 %v4464_v31, %v3295_v29  ;;  %v3375_v11 = vld [vmem:[#allocation2 + $0x348] sm:$0xf]  ;;  %v4420_v15 = vld [vmem:[#allocation2 + $0x154] sm:$0xf0] }
  0x65   :  { %1411 = vmatpush.bf16.msra.mxu3 %v3500_v34  ;;  %v4496_v34 = vld [vmem:[#allocation2 + $0x3b4] sm:$0xf0]  ;;  %v3119_v14 = vld [vmem:[#allocation2 + $0x148] sm:$0xf] }
  0x66   :  { %1423 = vmatpush.bf16.msrb.mxu2 %v3644_v27  ;;  %1386 = vmatpush.bf16.msra.mxu0 %v3228_v46  ;;  %v4400_v27 = vld [vmem:[#allocation2 + $0xb4] sm:$0xf0]  ;;  %v3424_v42 = vor.u32 %v4496_v34, %v3423_v33  ;;  %v3168_v46 = vor.u32 %v4432_v38, %v3167_v37  ;;  %v2975_v17 = vld [vmem:[#allocation2 + $0x28] sm:$0xf] }
  0x67   :  { %1399 = vmatpush.bf16.msra.mxu1 %v3356_v47  ;;  %v3040_v36 = vor.u32 %v4400_v27, %v3039_v26  ;;  %v3407_v47 = vld [vmem:[#allocation2 + $0x388] sm:$0xf]  ;;  %v4384_v18 = vld [vmem:[#allocation2 + $0x34] sm:$0xf0] }
  0x68   :  { %v3408_v58 = vor.u32 %v4492_v48, %v3407_v47  ;;  %v3231_v20 = vld [vmem:[#allocation2 + $0x228] sm:$0xf]  ;;  %v4448_v21 = vld [vmem:[#allocation2 + $0x234] sm:$0xf0]  ;;  %v4406_v47 = vld [vmem:[#allocation2 + $0xec] sm:$0xf] }
  0x69   :  { %1412 = vmatpush.bf16.msra.mxu3 %v3484_v52  ;;  %v4428_v52 = vld [vmem:[#allocation2 + $0x194] sm:$0xf0]  ;;  %v3359_v23 = vld [vmem:[#allocation2 + $0x328] sm:$0xf]  ;;  %v3232_v29 = vor.u32 %v4448_v21, %v3231_v20  ;;  %v3073_v48 = vld [vmem:[#allocation2 + $0xf8] sm:$0xf0] }
  0x6a   :  { %1424 = vmatpush.bf16.msrb.mxu2 %v3628_v41  ;;  %1387 = vmatpush.bf16.msra.mxu0 %v3212_v0  ;;  %v4396_v41 = vld [vmem:[#allocation2 + $0x94] sm:$0xf0]  ;;  %v3152_v61 = vor.u32 %v4428_v52, %v3151_v50  ;;  %v3008_v0 = vor.u32 %v4392_v56, %v3007_v54  ;;  %v3103_v26 = vld [vmem:[#allocation2 + $0x128] sm:$0xf]  ;;  %v3076_v63 = vor.u32 %v4406_v47, %v3073_v48 }
  0x6b   :  { %1400 = vmatpush.bf16.msra.mxu1 %v3340_v1  ;;  %v3024_v49 = vor.u32 %v4396_v41, %v3023_v40  ;;  %v3135_v1 = vld [vmem:[#allocation2 + $0x168] sm:$0xf]  ;;  %v4480_v24 = vld [vmem:[#allocation2 + $0x334] sm:$0xf0] }
  0x6c   :  { %v3136_v10 = vor.u32 %v4424_v2, %v3135_v1  ;;  %v4416_v27 = vld [vmem:[#allocation2 + $0x134] sm:$0xf0]  ;;  %v3360_v34 = vor.u32 %v4480_v24, %v3359_v23  ;;  %v3215_v37 = vld [vmem:[#allocation2 + $0x208] sm:$0xf]  ;;  %v4402_v1 = vld [vmem:[#allocation2 + $0xcc] sm:$0xf] }
  0x6d   :  { %1413 = vmatpush.bf16.msra.mxu3 %v3468_v4  ;;  %1388 = vmatmul.bf16.vlgmr.msra.gmra.mxu0 %v4849_v51  ;;  %v2991_v4 = vld [vmem:[#allocation2 + $0x48] sm:$0xf]  ;;  %v4380_v31 = vld [vmem:[#allocation2 + $0x14] sm:$0xf0]  ;;  %v3104_v40 = vor.u32 %v4416_v27, %v3103_v26  ;;  %v3057_v2 = vld [vmem:[#allocation2 + $0xd8] sm:$0xf0] }
  0x6e   :  { %1425 = vmatpush.bf16.msrb.mxu2 %v3612_v60  ;;  %1471 = vmatpush.bf16.msrb.mxu0 %v3328_v12  ;;  %v4456_v60 = vld [vmem:[#allocation2 + $0x274] sm:$0xf0]  ;;  %v3711_v52 = vld [vmem:[#allocation2 + $0x5e8] sm:$0xf]  ;;  %v3169_v23 = vld [vmem:[#allocation2 + $0x1b8] sm:$0xf0] }
  0x6f   :  { %1445 = vmatpush.bf16.msrb.mxu1 %v3072_v5  ;;  %v3264_v3 = vor.u32 %v4456_v60, %v3263_v59  ;;  %v4388_v5 = vld [vmem:[#allocation2 + $0x54] sm:$0xf0]  ;;  %v3567_v54 = vld [vmem:[#allocation2 + $0x4c8] sm:$0xf]  ;;  %v4438_v60 = vld [vmem:[#allocation2 + $0x1ec] sm:$0xf] }
  0x70   :  { %1414 = vmatmul.bf16.vlgmr.msra.gmra.mxu3 %v4877_v30  ;;  %1401 = vmatmul.bf16.vlgmr.msra.gmra.mxu1 %v4853_v57  ;;  %v4484_v12 = vld [vmem:[#allocation2 + $0x354] sm:$0xf0]  ;;  %v3535_v20 = vld [vmem:[#allocation2 + $0x488] sm:$0xf]  ;;  %v4394_v26 = vld [vmem:[#allocation2 + $0x8c] sm:$0xf] }
  0x71   :  { %1439 = vmatpush.bf16.msrb.mxu3 %v3724_v9  ;;  %v4452_v9 = vld [vmem:[#allocation2 + $0x254] sm:$0xf0]  ;;  %v3025_v27 = vld [vmem:[#allocation2 + $0x98] sm:$0xf0]  ;;  %v3503_v47 = vld [vmem:[#allocation2 + $0x448] sm:$0xf] }
  0x72   :  { %1426 = vmatpush.bf16.msrb.mxu2 %v3596_v13  ;;  %1472 = vmatpush.bf16.msrb.mxu0 %v3312_v25  ;;  %v2992_v13 = vor.u32 %v4388_v5, %v2991_v4  ;;  %v2976_v25 = vor.u32 %v4384_v18, %v2975_v17  ;;  %v4536_v33 = vld [vmem:[#allocation2 + $0x4f4] sm:$0xf0]  ;;  %v3695_v5 = vld [vmem:[#allocation2 + $0x5c8] sm:$0xf] }
  0x73   :  { %1446 = vmatpush.bf16.msrb.mxu1 %v3056_v22  ;;  %v3120_v22 = vor.u32 %v4420_v15, %v3119_v14  ;;  %v4444_v38 = vld [vmem:[#allocation2 + $0x214] sm:$0xf0]  ;;  %v4398_v14 = vld [vmem:[#allocation2 + $0xac] sm:$0xf]  ;;  %v3041_v15 = vld [vmem:[#allocation2 + $0xb8] sm:$0xf0] }
  0x74   :  { %v4476_v41 = vld [vmem:[#allocation2 + $0x314] sm:$0xf0]  ;;  %v3216_v50 = vor.u32 %v4444_v38, %v3215_v37  ;;  %v3679_v18 = vld [vmem:[#allocation2 + $0x5a8] sm:$0xf]  ;;  %v3044_v24 = vor.u32 %v4398_v14, %v3041_v15  ;;  %v3153_v37 = vld [vmem:[#allocation2 + $0x198] sm:$0xf0]  ;;  %v3028_v38 = vor.u32 %v4394_v26, %v3025_v27 }
  0x75   :  { %1458 = vmatpush.bf16.msra.mxu3 %v3200_v19  ;;  %1427 = vmatmul.bf16.vlgmr.msrb.gmra.mxu2 %v4879_v35  ;;  %v3376_v19 = vor.u32 %v4484_v12, %v3375_v11  ;;  %v4572_v43 = vld [vmem:[#allocation2 + $0x614] sm:$0xf0]  ;;  %v3185_v11 = vld [vmem:[#allocation2 + $0x1d8] sm:$0xf0]  ;;  %v3060_v12 = vor.u32 %v4402_v1, %v3057_v2 }
  0x76   :  { %1484 = vmatpush.bf16.msra.mxu2 %v3456_v16  ;;  %1473 = vmatpush.bf16.msrb.mxu0 %v3296_v39  ;;  %v3248_v16 = vor.u32 %v4452_v9, %v3247_v8  ;;  %v3343_v39 = vld [vmem:[#allocation2 + $0x308] sm:$0xf]  ;;  %v4528_v9 = vld [vmem:[#allocation2 + $0x4b4] sm:$0xf0]  ;;  %v3121_v1 = vld [vmem:[#allocation2 + $0x158] sm:$0xf0] }
  0x77   :  { %1447 = vmatpush.bf16.msrb.mxu1 %v3040_v36  ;;  %v3087_v36 = vld [vmem:[#allocation2 + $0x108] sm:$0xf]  ;;  %v3344_v56 = vor.u32 %v4476_v41, %v3343_v39  ;;  %v4524_v21 = vld [vmem:[#allocation2 + $0x494] sm:$0xf0]  ;;  %v3009_v41 = vld [vmem:[#allocation2 + $0x78] sm:$0xf0] }
  0x78   :  { %v3551_v8 = vld [vmem:[#allocation2 + $0x4a8] sm:$0xf]  ;;  %v4516_v48 = vld [vmem:[#allocation2 + $0x454] sm:$0xf0]  ;;  %v3105_v14 = vld [vmem:[#allocation2 + $0x138] sm:$0xf0] }
  0x79   :  { %1459 = vmatpush.bf16.msra.mxu3 %v3184_v32  ;;  %v3583_v32 = vld [vmem:[#allocation2 + $0x4e8] sm:$0xf]  ;;  %v3457_v26 = vld [vmem:[#allocation2 + $0x3f8] sm:$0xf0] }
  0x7a   :  { %1485 = vmatpush.bf16.msra.mxu2 %v3440_v28  ;;  %1474 = vmatpush.bf16.msrb.mxu0 %v3280_v53  ;;  %v2959_v28 = vld [vmem:[#allocation2 + $0x8] sm:$0xf]  ;;  %v4568_v53 = vld [vmem:[#allocation2 + $0x5f4] sm:$0xf0] }
  0x7b   :  { %1448 = vmatpush.bf16.msrb.mxu1 %v3024_v49  ;;  %v2960_v44 = vor.u32 %v4380_v31, %v2959_v28  ;;  %v3584_v49 = vor.u32 %v4536_v33, %v3583_v32  ;;  %v3536_v28 = vor.u32 %v4524_v21, %v3535_v20  ;;  %v3663_v31 = vld [vmem:[#allocation2 + $0x588] sm:$0xf]  ;;  %v4556_v32 = vld [vmem:[#allocation2 + $0x594] sm:$0xf0]  ;;  %v4378_v20 = vld [vmem:[#allocation2 + $0xc] sm:$0xf] }
  0x7c   :  { %v3519_v33 = vld [vmem:[#allocation2 + $0x468] sm:$0xf]  ;;  %v3664_v39 = vor.u32 %v4556_v32, %v3663_v31  ;;  %v2961_v21 = vld [vmem:[#allocation2 + $0x18] sm:$0xf0]  ;;  %v4466_v31 = vld [vmem:[#allocation2 + $0x2cc] sm:$0xf] }
  0x7d   :  { %1460 = vmatpush.bf16.msra.mxu3 %v3168_v46  ;;  %v4412_v46 = vld [vmem:[#allocation2 + $0x114] sm:$0xf0]  ;;  %v2964_v32 = vor.u32 %v4378_v20, %v2961_v21  ;;  %v4486_v20 = vld [vmem:[#allocation2 + $0x36c] sm:$0xf] }
  0x7e   :  { %1486 = vmatpush.bf16.msra.mxu2 %v3424_v42  ;;  %1475 = vmatpush.bf16.msrb.mxu0 %v3264_v3  ;;  %v3727_v42 = vld [vmem:[#allocation2 + $0x608] sm:$0xf]  ;;  %v3088_v62 = vor.u32 %v4412_v46, %v3087_v36  ;;  %v4426_v36 = vld [vmem:[#allocation2 + $0x18c] sm:$0xf]  ;;  %v4552_v46 = vld [vmem:[#allocation2 + $0x574] sm:$0xf0] }
  0x7f   :  { %1449 = vmatpush.bf16.msrb.mxu1 %v3008_v0  ;;  %v3728_v59 = vor.u32 %v4572_v43, %v3727_v42  ;;  %v3712_v0 = vor.u32 %v4568_v53, %v3711_v52  ;;  %v3156_v43 = vor.u32 %v4426_v36, %v3153_v37  ;;  %v3089_v36 = vld [vmem:[#allocation2 + $0x118] sm:$0xf0] }
  0x80   :  { %3734 = vmatmul.msk.bf16.vlgmr.msrb.gmra.mxu3 %vm1259_vm0, %v4867_v45 }
  0x81   :  { %1461 = vmatpush.bf16.msra.mxu3 %v3152_v61  ;;  %v3201_v61 = vld [vmem:[#allocation2 + $0x1f8] sm:$0xf0] }
  0x82   :  { %1487 = vmatpush.bf16.msra.mxu2 %v3408_v58  ;;  %1476 = vmatpush.bf16.msrb.mxu0 %v3248_v16  ;;  %v4532_v58 = vld [vmem:[#allocation2 + $0x4d4] sm:$0xf0]  ;;  %v3204_v4 = vor.u32 %v4438_v60, %v3201_v61  ;;  %v3552_v16 = vor.u32 %v4528_v9, %v3551_v8  ;;  %v3631_v60 = vld [vmem:[#allocation2 + $0x548] sm:$0xf] }
  0x83   :  { %1450 = vmatpush.bf16.msrb.mxu1 %v2992_v13  ;;  %v3568_v3 = vor.u32 %v4532_v58, %v3567_v54  ;;  %v4386_v54 = vld [vmem:[#allocation2 + $0x4c] sm:$0xf]  ;;  %v3504_v58 = vor.u32 %v4516_v48, %v3503_v47  ;;  %v4548_v61 = vld [vmem:[#allocation2 + $0x554] sm:$0xf0]  ;;  %v3615_v9 = vld [vmem:[#allocation2 + $0x528] sm:$0xf] }
  0x84   :  { %v4530_v47 = vld [vmem:[#allocation2 + $0x4cc] sm:$0xf]  ;;  %v3569_v48 = vld [vmem:[#allocation2 + $0x4d8] sm:$0xf0] }
  0x85   :  { %1462 = vmatpush.bf16.msra.mxu3 %v3136_v10  ;;  %v4434_v10 = vld [vmem:[#allocation2 + $0x1cc] sm:$0xf] }
  0x86   :  { %1488 = vmatpush.bf16.msra.mxu2 %v3392_v6  ;;  %1477 = vmatpush.bf16.msrb.mxu0 %v3232_v29  ;;  %v4564_v6 = vld [vmem:[#allocation2 + $0x5d4] sm:$0xf0]  ;;  %v3188_v17 = vor.u32 %v4434_v10, %v3185_v11  ;;  %v3471_v11 = vld [vmem:[#allocation2 + $0x408] sm:$0xf] }
  0x87   :  { %1451 = vmatpush.bf16.msrb.mxu1 %v2976_v25  ;;  %v3696_v13 = vor.u32 %v4564_v6, %v3695_v5  ;;  %v2977_v5 = vld [vmem:[#allocation2 + $0x38] sm:$0xf0]  ;;  %v4544_v10 = vld [vmem:[#allocation2 + $0x534] sm:$0xf0] }
  0x89   :  { %1463 = vmatpush.bf16.msra.mxu3 %v3120_v22  ;;  %v4430_v22 = vld [vmem:[#allocation2 + $0x1ac] sm:$0xf] }
  0x8a   :  { %1489 = vmatpush.bf16.msra.mxu2 %v3376_v19  ;;  %1478 = vmatpush.bf16.msrb.mxu0 %v3216_v50  ;;  %v4560_v19 = vld [vmem:[#allocation2 + $0x5b4] sm:$0xf0]  ;;  %v3172_v29 = vor.u32 %v4430_v22, %v3169_v23  ;;  %v3137_v50 = vld [vmem:[#allocation2 + $0x178] sm:$0xf0] }
  0x8b   :  { %1452 = vmatpush.bf16.msrb.mxu1 %v2960_v44  ;;  %v3680_v25 = vor.u32 %v4560_v19, %v3679_v18  ;;  %v3647_v44 = vld [vmem:[#allocation2 + $0x568] sm:$0xf]  ;;  %v3616_v18 = vor.u32 %v4544_v10, %v3615_v9  ;;  %v3409_v10 = vld [vmem:[#allocation2 + $0x398] sm:$0xf0] }
  0x8c   :  { %v3648_v53 = vor.u32 %v4552_v46, %v3647_v44  ;;  %v3599_v19 = vld [vmem:[#allocation2 + $0x508] sm:$0xf]  ;;  %v3441_v46 = vld [vmem:[#allocation2 + $0x3d8] sm:$0xf0] }
  0x8d   :  { %1464 = vmatpush.bf16.msra.mxu3 %v3104_v40  ;;  %1479 = vmatmul.bf16.vlgmr.msrb.gmra.mxu0 %v4849_v51  ;;  %v4390_v40 = vld [vmem:[#allocation2 + $0x6c] sm:$0xf] }
  0x8e   :  { %1490 = vmatpush.bf16.msra.mxu2 %v3360_v34  ;;  %1530 = vmatpush.bf16.msra.mxu0 %v3728_v59  ;;  %v4520_v34 = vld [vmem:[#allocation2 + $0x474] sm:$0xf0]  ;;  %v3012_v52 = vor.u32 %v4390_v40, %v3009_v41 }
  0x8f   :  { %1497 = vmatpush.bf16.msra.mxu1 %v3584_v49  ;;  %v3520_v42 = vor.u32 %v4520_v34, %v3519_v33  ;;  %v4422_v49 = vld [vmem:[#allocation2 + $0x16c] sm:$0xf]  ;;  %v3313_v33 = vld [vmem:[#allocation2 + $0x2d8] sm:$0xf0] }
  0x90   :  { %1453 = vmatmul.bf16.vlgmr.msrb.gmra.mxu1 %v4851_v55  ;;  %v3140_v59 = vor.u32 %v4422_v49, %v3137_v50  ;;  %v4410_v34 = vld [vmem:[#allocation2 + $0x10c] sm:$0xf] }
  0x91   :  { %1465 = vmatpush.bf16.msra.mxu3 %v3088_v62  ;;  %v3487_v62 = vld [vmem:[#allocation2 + $0x428] sm:$0xf]  ;;  %v3092_v44 = vor.u32 %v4410_v34, %v3089_v36  ;;  %v4462_v50 = vld [vmem:[#allocation2 + $0x2ac] sm:$0xf] }
  0x92   :  { %1491 = vmatpush.bf16.msra.mxu2 %v3344_v56  ;;  %1549 = vmatpush.bf16.msrb.mxu0 %v3204_v4  ;;  %v2993_v56 = vld [vmem:[#allocation2 + $0x58] sm:$0xf0]  ;;  %v4382_v4 = vld [vmem:[#allocation2 + $0x2c] sm:$0xf] }
  0x93   :  { %1498 = vmatpush.bf16.msra.mxu1 %v3568_v3  ;;  %v2996_v2 = vor.u32 %v4386_v54, %v2993_v56  ;;  %v3632_v3 = vor.u32 %v4548_v61, %v3631_v60  ;;  %v2980_v15 = vor.u32 %v4382_v4, %v2977_v5  ;;  %v3697_v54 = vld [vmem:[#allocation2 + $0x5d8] sm:$0xf0]  ;;  %v4482_v34 = vld [vmem:[#allocation2 + $0x34c] sm:$0xf] }
  0x94   :  { %1466 = vmatmul.bf16.vlgmr.msra.gmra.mxu3 %v4860_v7  ;;  %v3425_v61 = vld [vmem:[#allocation2 + $0x3b8] sm:$0xf0] }
  0x95   :  { %1510 = vmatpush.bf16.msrb.mxu3 %v3712_v0  ;;  %1492 = vmatmul.bf16.vlgmr.msra.gmra.mxu2 %v4853_v57  ;;  %v4418_v0 = vld [vmem:[#allocation2 + $0x14c] sm:$0xf]  ;;  %v3681_v4 = vld [vmem:[#allocation2 + $0x5b8] sm:$0xf0] }
  0x96   :  { %1536 = vmatpush.bf16.msrb.mxu2 %v3076_v63  ;;  %1550 = vmatpush.bf16.msrb.mxu0 %v3188_v17  ;;  %v4512_v63 = vld [vmem:[#allocation2 + $0x434] sm:$0xf0]  ;;  %v3124_v8 = vor.u32 %v4418_v0, %v3121_v1  ;;  %v3329_v17 = vld [vmem:[#allocation2 + $0x2f8] sm:$0xf0]  ;;  %v4458_v1 = vld [vmem:[#allocation2 + $0x28c] sm:$0xf] }
  0x97   :  { %1499 = vmatpush.bf16.msra.mxu1 %v3552_v16  ;;  %v3488_v6 = vor.u32 %v4512_v63, %v3487_v62  ;;  %v4470_v16 = vld [vmem:[#allocation2 + $0x2ec] sm:$0xf]  ;;  %v3553_v63 = vld [vmem:[#allocation2 + $0x4b8] sm:$0xf0] }
  0x98   :  { %v3332_v27 = vor.u32 %v4470_v16, %v3329_v17  ;;  %v4526_v62 = vld [vmem:[#allocation2 + $0x4ac] sm:$0xf]  ;;  %v3665_v17 = vld [vmem:[#allocation2 + $0x598] sm:$0xf0] }
  0x99   :  { %1511 = vmatpush.bf16.msrb.mxu3 %v3696_v13  ;;  %v4414_v13 = vld [vmem:[#allocation2 + $0x12c] sm:$0xf] }
  0x9a   :  { %1537 = vmatpush.bf16.msrb.mxu2 %v3060_v12  ;;  %1551 = vmatpush.bf16.msrb.mxu0 %v3172_v29  ;;  %v4508_v12 = vld [vmem:[#allocation2 + $0x414] sm:$0xf0]  ;;  %v3108_v23 = vor.u32 %v4414_v13, %v3105_v14  ;;  %v3585_v29 = vld [vmem:[#allocation2 + $0x4f8] sm:$0xf0]  ;;  %v4454_v14 = vld [vmem:[#allocation2 + $0x26c] sm:$0xf] }
  0x9b   :  { %1500 = vmatpush.bf16.msra.mxu1 %v3536_v28  ;;  %v3472_v22 = vor.u32 %v4508_v12, %v3471_v11  ;;  %v4534_v28 = vld [vmem:[#allocation2 + $0x4ec] sm:$0xf]  ;;  %v3537_v12 = vld [vmem:[#allocation2 + $0x498] sm:$0xf0] }
  0x9c   :  { %v3588_v41 = vor.u32 %v4534_v28, %v3585_v29  ;;  %v4522_v11 = vld [vmem:[#allocation2 + $0x48c] sm:$0xf]  ;;  %v3649_v29 = vld [vmem:[#allocation2 + $0x578] sm:$0xf0] }
  0x9d   :  { %1512 = vmatpush.bf16.msrb.mxu3 %v3680_v25  ;;  %3735 = vmatmul.msk.bf16.vlgmr.msra.gmra.mxu0 %vm1259_vm0, %v4867_v45  ;;  %v4502_v25 = vld [vmem:[#allocation2 + $0x3ec] sm:$0xf] }
  0x9e   :  { %1538 = vmatpush.bf16.msrb.mxu2 %v3044_v24  ;;  %1552 = vmatpush.bf16.msrb.mxu0 %v3156_v43  ;;  %v4540_v24 = vld [vmem:[#allocation2 + $0x514] sm:$0xf0]  ;;  %v3460_v40 = vor.u32 %v4502_v25, %v3457_v26  ;;  %v3316_v43 = vor.u32 %v4466_v31, %v3313_v33  ;;  %v4450_v26 = vld [vmem:[#allocation2 + $0x24c] sm:$0xf] }
  0x9f   :  { %1501 = vmatpush.bf16.msra.mxu1 %v3520_v42  ;;  %v3600_v37 = vor.u32 %v4540_v24, %v3599_v19  ;;  %v4498_v42 = vld [vmem:[#allocation2 + $0x3cc] sm:$0xf]  ;;  %v3540_v19 = vor.u32 %v4522_v11, %v3537_v12  ;;  %v3521_v24 = vld [vmem:[#allocation2 + $0x478] sm:$0xf0] }
  0xa0   :  { %v3444_v56 = vor.u32 %v4498_v42, %v3441_v46  ;;  %v4550_v28 = vld [vmem:[#allocation2 + $0x56c] sm:$0xf]  ;;  %v3473_v11 = vld [vmem:[#allocation2 + $0x418] sm:$0xf0] }
  0xa1   :  { %1513 = vmatpush.bf16.msrb.mxu3 %v3664_v39  ;;  %v3713_v39 = vld [vmem:[#allocation2 + $0x5f8] sm:$0xf0]  ;;  %v4446_v42 = vld [vmem:[#allocation2 + $0x22c] sm:$0xf] }
  0xa2   :  { %1539 = vmatpush.bf16.msrb.mxu2 %v3028_v38  ;;  %1553 = vmatpush.bf16.msrb.mxu0 %v3140_v59  ;;  %v4566_v38 = vld [vmem:[#allocation2 + $0x5ec] sm:$0xf] }
  0xa3   :  { %1502 = vmatpush.bf16.msra.mxu1 %v3504_v58  ;;  %v3716_v49 = vor.u32 %v4566_v38, %v3713_v39  ;;  %v3572_v58 = vor.u32 %v4530_v47, %v3569_v48  ;;  %v4494_v59 = vld [vmem:[#allocation2 + $0x3ac] sm:$0xf]  ;;  %v3377_v38 = vld [vmem:[#allocation2 + $0x358] sm:$0xf0] }
  0xa4   :  { %v3428_v5 = vor.u32 %v4494_v59, %v3425_v61  ;;  %v4514_v39 = vld [vmem:[#allocation2 + $0x44c] sm:$0xf]  ;;  %v3633_v47 = vld [vmem:[#allocation2 + $0x558] sm:$0xf0]  ;;  %v3380_v48 = vor.u32 %v4482_v34, %v3377_v38  ;;  %v3819_v38 = vld [vmem:[#allocation4 + $0xa0] sm:$0xf] }
  0xa5   :  { %1514 = vmatpush.bf16.msrb.mxu3 %v3648_v53  ;;  %v4562_v53 = vld [vmem:[#allocation2 + $0x5cc] sm:$0xf] }
  0xa6   :  { %1540 = vmatpush.bf16.msrb.mxu2 %v3012_v52  ;;  %1554 = vmatpush.bf16.msrb.mxu0 %v3124_v8  ;;  %v3297_v52 = vld [vmem:[#allocation2 + $0x2b8] sm:$0xf0]  ;;  %v3700_v0 = vor.u32 %v4562_v53, %v3697_v54  ;;  %v4490_v8 = vld [vmem:[#allocation2 + $0x38c] sm:$0xf] }
  0xa7   :  { %1503 = vmatpush.bf16.msra.mxu1 %v3488_v6  ;;  %v3300_v60 = vor.u32 %v4462_v50, %v3297_v52  ;;  %v3556_v6 = vor.u32 %v4526_v62, %v3553_v63  ;;  %v4546_v46 = vld [vmem:[#allocation2 + $0x54c] sm:$0xf]  ;;  %v3361_v53 = vld [vmem:[#allocation2 + $0x338] sm:$0xf0] }
  0xa8   :  { %v4478_v50 = vld [vmem:[#allocation2 + $0x32c] sm:$0xf]  ;;  %v3617_v63 = vld [vmem:[#allocation2 + $0x538] sm:$0xf0] }
  0xa9   :  { %1515 = vmatpush.bf16.msrb.mxu3 %v3632_v3  ;;  %v4558_v3 = vld [vmem:[#allocation2 + $0x5ac] sm:$0xf] }
  0xaa   :  { %1541 = vmatpush.bf16.msrb.mxu2 %v2996_v2  ;;  %1555 = vmatpush.bf16.msrb.mxu0 %v3108_v23  ;;  %v3281_v2 = vld [vmem:[#allocation2 + $0x298] sm:$0xf0]  ;;  %v3684_v13 = vor.u32 %v4558_v3, %v3681_v4  ;;  %v4518_v23 = vld [vmem:[#allocation2 + $0x46c] sm:$0xf]  ;;  %v3364_v4 = vor.u32 %v4478_v50, %v3361_v53 }
  0xab   :  { %1504 = vmatpush.bf16.msra.mxu1 %v3472_v22  ;;  %v3284_v9 = vor.u32 %v4458_v1, %v3281_v2  ;;  %v3393_v22 = vld [vmem:[#allocation2 + $0x378] sm:$0xf0]  ;;  %v4903_v25 = vpop.f32.mrf.mxu1  ;;  %v3524_v33 = vor.u32 %v4518_v23, %v3521_v24  ;;  %v4510_v54 = vld [vmem:[#allocation2 + $0x42c] sm:$0xf]  ;;  %v4912_v2 = vld [vmem:[%s5104_s2] sm:$0xf] }
  0xac   :  { %v4442_v59 = vld [vmem:[#allocation2 + $0x20c] sm:$0xf]  ;;  %v3729_v1 = vld [vmem:[#allocation2 + $0x618] sm:$0xf0] }
  0xad   :  { %1516 = vmatpush.bf16.msrb.mxu3 %v3616_v18  ;;  %v3412_v18 = vor.u32 %v4490_v8, %v3409_v10  ;;  %v4542_v61 = vld [vmem:[#allocation2 + $0x52c] sm:$0xf] }
  0xae   :  { %1542 = vmatpush.bf16.msrb.mxu2 %v2980_v15  ;;  %1505 = vmatmul.bf16.vlgmr.msra.gmra.mxu1 %v4877_v30  ;;  %v3265_v15 = vld [vmem:[#allocation2 + $0x278] sm:$0xf0]  ;;  %v4901_v16 = vpop.f32.mrf.mxu0  ;;  %v4506_v10 = vld [vmem:[#allocation2 + $0x40c] sm:$0xf] }
  0xaf   :  { %1562 = vmatpush.bf16.msrb.mxu1 %v3332_v27  ;;  %1556 = vmatpush.bf16.msrb.mxu0 %v3092_v44  ;;  %v3268_v21 = vor.u32 %v4454_v14, %v3265_v15  ;;  %v3249_v27 = vld [vmem:[#allocation2 + $0x258] sm:$0xf0]  ;;  %v3851_v14 = vld [vmem:[#allocation4 + $0xe0] sm:$0xf]  ;;  %v4603_v15 = vld [vmem:[#allocation4 + $0xec] sm:$0xf0]  ;;  %v3476_v23 = vor.u32 %v4506_v10, %v3473_v11 }
  0xb0   :  { %v3252_v36 = vor.u32 %v4450_v26, %v3249_v27  ;;  %v3852_v24 = vor.u32 %v4603_v15, %v3851_v14  ;;  %v3835_v26 = vld [vmem:[#allocation4 + $0xc0] sm:$0xf]  ;;  %v4599_v27 = vld [vmem:[#allocation4 + $0xcc] sm:$0xf0] }
  0xb1   :  { %1517 = vmatpush.bf16.msrb.mxu3 %v3600_v37  ;;  %v3883_v11 = vld [vmem:[#allocation4 + $0x120] sm:$0xf]  ;;  %v4575_v15 = vld [vmem:[#allocation4 + $0xc] sm:$0xf0] }
  0xb2   :  { %1543 = vmatpush.bf16.msrb.mxu2 %v2964_v32  ;;  %1557 = vmatmul.bf16.vlgmr.msrb.gmra.mxu0 %v4860_v7  ;;  %v3396_v32 = vor.u32 %v4486_v20, %v3393_v22  ;;  %v4635_v20 = vld [vmem:[#allocation4 + $0x1ec] sm:$0xf0]  ;;  %v3739_v14 = vld [vmem:[#allocation4] sm:$0xf] }
  0xb3   :  { %1563 = vmatpush.bf16.msrb.mxu1 %v3316_v43  ;;  %1601 = vmatpush.bf16.msra.mxu0 %v3716_v49  ;;  %v4905_v31 = vpop.f32.mrf.mxu2  ;;  %v4907_v37 = vpop.f32.mrf.mxu3  ;;  %v3233_v43 = vld [vmem:[#allocation2 + $0x238] sm:$0xf0] }
  0xb4   :  { %1518 = vmatmul.bf16.vlgmr.msrb.gmra.mxu3 %v4879_v35  ;;  %v3236_v52 = vor.u32 %v4446_v42, %v3233_v43  ;;  %v1287_v62 = vpop.f32.mrf.mxu1  ;;  %v4627_v42 = vld [vmem:[#allocation4 + $0x1ac] sm:$0xf0] }
  0xb5   :  { %1575 = vmatpush.bf16.msra.mxu3 %v3460_v40  ;;  %1544 = vmatmul.bf16.vlgmr.msrb.gmra.mxu2 %v4851_v55  ;;  %v4554_v55 = vld [vmem:[#allocation2 + $0x58c] sm:$0xf]  ;;  %v3505_v40 = vld [vmem:[#allocation2 + $0x458] sm:$0xf0]  ;;  %v4583_v62 = vld [vmem:[#allocation4 + $0x4c] sm:$0xf0] }
  0xb6   :  { %1588 = vmatpush.bf16.msra.mxu2 %v3588_v41  ;;  %v3668_v7 = vor.u32 %v4554_v55, %v3665_v17  ;;  %v3652_v41 = vor.u32 %v4550_v28, %v3649_v29  ;;  %v1274_v44 = vpop.f32.mrf.mxu0  ;;  %v3508_v49 = vor.u32 %v4514_v39, %v3505_v40  ;;  %v4538_v55 = vld [vmem:[#allocation2 + $0x50c] sm:$0xf]  ;;  %v3963_v29 = vld [vmem:[#allocation4 + $0x1c0] sm:$0xf]  ;;  %v4595_v39 = vld [vmem:[#allocation4 + $0xac] sm:$0xf0] }
  0xb7   :  { %1564 = vmatpush.bf16.msrb.mxu1 %v3300_v60  ;;  %1602 = vmatpush.bf16.msra.mxu0 %v3700_v0  ;;  %v3217_v60 = vld [vmem:[#allocation2 + $0x218] sm:$0xf0]  ;;  %v4570_v0 = vld [vmem:[#allocation2 + $0x60c] sm:$0xf]  ;;  %v4591_v44 = vld [vmem:[#allocation4 + $0x8c] sm:$0xf0] }
  0xb8   :  { %v3220_v8 = vor.u32 %v4442_v59, %v3217_v60  ;;  %v3732_v17 = vor.u32 %v4570_v0, %v3729_v1  ;;  %v3899_v0 = vld [vmem:[#allocation4 + $0x140] sm:$0xf]  ;;  %v4615_v1 = vld [vmem:[#allocation4 + $0x14c] sm:$0xf0] }
  0xb9   :  { %1576 = vmatpush.bf16.msra.mxu3 %v3444_v56  ;;  %v3489_v56 = vld [vmem:[#allocation2 + $0x438] sm:$0xf0]  ;;  %v3900_v10 = vor.u32 %v4615_v1, %v3899_v0  ;;  %v4651_v0 = vld [vmem:[#allocation4 + $0x26c] sm:$0xf0]  ;;  %v272_v1 = vperm.slane %v4912_v2, 1 }
  0xba   :  { %1589 = vmatpush.bf16.msra.mxu2 %v3572_v58  ;;  %v3636_v58 = vor.u32 %v4546_v46, %v3633_v47 }
  0xbb   :  { %1565 = vmatpush.bf16.msrb.mxu1 %v3284_v9  ;;  %1603 = vmatpush.bf16.msra.mxu0 %v3684_v13  ;;  %v1300_v3 = vpop.f32.mrf.mxu2  ;;  %v3345_v9 = vld [vmem:[#allocation2 + $0x318] sm:$0xf0]  ;;  %v1313_v12 = vpop.f32.mrf.mxu3  ;;  %v3620_v13 = vor.u32 %v4542_v61, %v3617_v63  ;;  %v3771_v61 = vld [vmem:[#allocation4 + $0x40] sm:$0xf] }
  0xbc   :  { %v4611_v12 = vld [vmem:[#allocation4 + $0x12c] sm:$0xf0] }
  0xbd   :  { %1577 = vmatpush.bf16.msra.mxu3 %v3428_v5  ;;  %v3492_v5 = vor.u32 %v4510_v54, %v3489_v56  ;;  %v4587_v54 = vld [vmem:[#allocation4 + $0x6c] sm:$0xf0]  ;;  %v3915_v56 = vld [vmem:[#allocation4 + $0x160] sm:$0xf] }
  0xbe   :  { %1590 = vmatpush.bf16.msra.mxu2 %v3556_v6  ;;  %v4474_v6 = vld [vmem:[#allocation2 + $0x30c] sm:$0xf] }
  0xbf   :  { %1566 = vmatpush.bf16.msrb.mxu1 %v3268_v21  ;;  %1604 = vmatpush.bf16.msra.mxu0 %v3668_v7  ;;  %v271_v21 = vperm.slane %v4912_v2, 0  ;;  %v3348_v22 = vor.u32 %v4474_v6, %v3345_v9  ;;  %v4579_v9 = vld [vmem:[#allocation4 + $0x2c] sm:$0xf0] }
  0xc1   :  { %1578 = vmatpush.bf16.msra.mxu3 %v3412_v18  ;;  %v3601_v18 = vld [vmem:[#allocation2 + $0x518] sm:$0xf0] }
  0xc2   :  { %1591 = vmatpush.bf16.msra.mxu2 %v3540_v19  ;;  %v3979_v19 = vld [vmem:[#allocation4 + $0x1e0] sm:$0xf]  ;;  %v3604_v7 = vor.u32 %v4538_v55, %v3601_v18 }
  0xc3   :  { %1567 = vmatpush.bf16.msrb.mxu1 %v3252_v36  ;;  %1605 = vmatpush.bf16.msra.mxu0 %v3652_v41  ;;  %v3980_v28 = vor.u32 %v4635_v20, %v3979_v19  ;;  %v4917_v34 = vpop.f32.mrf.mxu2  ;;  %v3836_v36 = vor.u32 %v4599_v27, %v3835_v26  ;;  %v3947_v41 = vld [vmem:[#allocation4 + $0x1a0] sm:$0xf]  ;;  %v4667_v19 = vld [vmem:[#allocation4 + $0x2ec] sm:$0xf0]  ;;  %v3981_v26 = vld [vmem:[#allocation4 + $0x1f0] sm:$0xf0]  ;;  %v3740_v27 = vor.u32 %v4575_v15, %v3739_v14 }
  0xc4   :  { %v3948_v46 = vor.u32 %v4627_v42, %v3947_v41  ;;  %v4107_v18 = vld [vmem:[#allocation4 + $0x2e0] sm:$0xf]  ;;  %v4629_v42 = vld [vmem:[#allocation4 + $0x1c4] sm:$0xf] }
  0xc5   :  { %1579 = vmatpush.bf16.msra.mxu3 %v3396_v32  ;;  %v4631_v32 = vld [vmem:[#allocation4 + $0x1cc] sm:$0xf0]  ;;  %v4581_v15 = vld [vmem:[#allocation4 + $0x44] sm:$0xf] }
  0xc6   :  { %1592 = vmatpush.bf16.msra.mxu2 %v3524_v33  ;;  %v1273_v33 = vadd.f32 %v4901_v16, %v271_v21  ;;  %v3964_v40 = vor.u32 %v4631_v32, %v3963_v29  ;;  %v3803_v16 = vld [vmem:[#allocation4 + $0x80] sm:$0xf]  ;;  %v3853_v21 = vld [vmem:[#allocation4 + $0xf0] sm:$0xf0] }
  0xc7   :  { %1568 = vmatpush.bf16.msrb.mxu1 %v3236_v52  ;;  %1606 = vmatpush.bf16.msra.mxu0 %v3636_v58  ;;  %v3804_v53 = vor.u32 %v4591_v44, %v3803_v16  ;;  %v4075_v44 = vld [vmem:[#allocation4 + $0x2a0] sm:$0xf] }
  0xc8   :  { %v1286_v43 = vadd.f32 %v4903_v25, %v1273_v33  ;;  %v3787_v25 = vld [vmem:[#allocation4 + $0x60] sm:$0xf] }
  0xc9   :  { %1580 = vmatpush.bf16.msra.mxu3 %v3380_v48  ;;  %v3931_v48 = vld [vmem:[#allocation4 + $0x180] sm:$0xf]  ;;  %v3788_v59 = vor.u32 %v4587_v54, %v3787_v25  ;;  %v4655_v54 = vld [vmem:[#allocation4 + $0x28c] sm:$0xf0] }
  0xca   :  { %1593 = vmatpush.bf16.msra.mxu2 %v3508_v49  ;;  %v1324_v47 = vpop.f32.mrf.mxu0  ;;  %v4623_v49 = vld [vmem:[#allocation4 + $0x18c] sm:$0xf0]  ;;  %v1299_v50 = vadd.f32 %v4905_v31, %v1286_v43  ;;  %v3965_v43 = vld [vmem:[#allocation4 + $0x1d0] sm:$0xf0]  ;;  %v4059_v25 = vld [vmem:[#allocation4 + $0x280] sm:$0xf] }
  0xcb   :  { %1569 = vmatpush.bf16.msrb.mxu1 %v3220_v8  ;;  %1607 = vmatpush.bf16.msra.mxu0 %v3620_v13  ;;  %v1352_v52 = vpop.f32.mrf.mxu2  ;;  %v3755_v8 = vld [vmem:[#allocation4 + $0x20] sm:$0xf] }
  0xcc   :  { %v1312_v58 = vadd.f32 %v4907_v37, %v1299_v50  ;;  %v3756_v13 = vor.u32 %v4579_v9, %v3755_v8  ;;  %v3949_v52 = vld [vmem:[#allocation4 + $0x1b0] sm:$0xf0]  ;;  %v4617_v9 = vld [vmem:[#allocation4 + $0x164] sm:$0xf] }
  0xcd   :  { %1581 = vmatpush.bf16.msra.mxu3 %v3364_v4 }
  0xce   :  { %1594 = vmatpush.bf16.msra.mxu2 %v3492_v5  ;;  %1570 = vmatmul.bf16.vlgmr.msrb.gmra.mxu1 %v4849_v51  ;;  %v3820_v51 = vor.u32 %v4595_v39, %v3819_v38  ;;  %v1325_v60 = vadd.f32 %v1324_v47, %v1312_v58  ;;  %v3772_v5 = vor.u32 %v4583_v62, %v3771_v61  ;;  %v4597_v38 = vld [vmem:[#allocation4 + $0xc4] sm:$0xf]  ;;  %v3837_v39 = vld [vmem:[#allocation4 + $0xd0] sm:$0xf0] }
  0xcf   :  { %1621 = vmatpush.bf16.msra.mxu1 %v3732_v17  ;;  %1608 = vmatpush.bf16.msra.mxu0 %v3604_v7  ;;  %v3884_v17 = vor.u32 %v4611_v12, %v3883_v11  ;;  %v4633_v7 = vld [vmem:[#allocation4 + $0x1e4] sm:$0xf]  ;;  %v3840_v16 = vor.u32 %v4597_v38, %v3837_v39  ;;  %v4060_v58 = vor.u32 %v4655_v54, %v4059_v25  ;;  %v4027_v12 = vld [vmem:[#allocation4 + $0x240] sm:$0xf] }
  0xd0   :  { %v4593_v47 = vld [vmem:[#allocation4 + $0xa4] sm:$0xf] }
  0xd1   :  { %1582 = vmatpush.bf16.msra.mxu3 %v3348_v22  ;;  %v3867_v22 = vld [vmem:[#allocation4 + $0x100] sm:$0xf]  ;;  %v4573_v38 = vld [vmem:[#allocation4 + $0x4] sm:$0xf] }
  0xd2   :  { %1595 = vmatpush.bf16.msra.mxu2 %v3476_v23  ;;  %1609 = vmatmul.bf16.vlgmr.msra.gmra.mxu0 %v4879_v35  ;;  %v4619_v35 = vld [vmem:[#allocation4 + $0x16c] sm:$0xf0]  ;;  %v1326_v3 = vpop.f32.mrf.mxu0 }
  0xd3   :  { %2426 = vmatpush.bf16.msrb.mxu1 %v3980_v28  ;;  %v3916_v63 = vor.u32 %v4619_v35, %v3915_v56  ;;  %v4925_v31 = vpop.f32.mrf.mxu3  ;;  %v4607_v23 = vld [vmem:[#allocation4 + $0x10c] sm:$0xf0]  ;;  %v3805_v56 = vld [vmem:[#allocation4 + $0x90] sm:$0xf0] }
  0xd4   :  { %1583 = vmatmul.bf16.vlgmr.msra.gmra.mxu3 %v4853_v57  ;;  %v1337_v57 = vpop.f32.mrf.mxu1  ;;  %v3868_v33 = vor.u32 %v4607_v23, %v3867_v22  ;;  %v1364_v14 = vadd.f32 %v4925_v31, %v272_v1 }
  0xd5   :  { %2413 = vmatpush.bf16.msrb.mxu3 %v3852_v24  ;;  %1596 = vmatmul.bf16.vlgmr.msra.gmra.mxu2 %v4877_v30  ;;  %v3932_v30 = vor.u32 %v4623_v49, %v3931_v48  ;;  %v1338_v37 = vadd.f32 %v1337_v57, %v1325_v60  ;;  %v4108_v24 = vor.u32 %v4667_v19, %v4107_v18  ;;  %v3821_v48 = vld [vmem:[#allocation4 + $0xb0] sm:$0xf0]  ;;  %v4625_v57 = vld [vmem:[#allocation4 + $0x1a4] sm:$0xf] }
  0xd6   :  { %v3968_v49 = vor.u32 %v4629_v42, %v3965_v43  ;;  %v3952_v35 = vor.u32 %v4625_v57, %v3949_v52  ;;  %v3933_v60 = vld [vmem:[#allocation4 + $0x190] sm:$0xf0]  ;;  %v4613_v19 = vld [vmem:[#allocation4 + $0x144] sm:$0xf]  ;;  %v4639_v42 = vld [vmem:[#allocation4 + $0x20c] sm:$0xf0] }
  0xd7   :  { %2427 = vmatpush.bf16.msrb.mxu1 %v3964_v40  ;;  %v1351_v55 = vadd.f32 %v4917_v34, %v1338_v37  ;;  %2439 = vmatpush.bf16.msrb.mxu2 %v4108_v24  ;;  %v4091_v34 = vld [vmem:[#allocation4 + $0x2c0] sm:$0xf]  ;;  %v3984_v40 = vor.u32 %v4633_v7, %v3981_v26  ;;  %v4643_v7 = vld [vmem:[#allocation4 + $0x22c] sm:$0xf0]  ;;  %v3859_v43 = vld [vmem:[#allocation4 + $0xe8] sm:$0xf] }
  0xd8   :  { %v4929_v6 = vpop.f32.mrf.mxu2  ;;  %v4011_v24 = vld [vmem:[#allocation4 + $0x220] sm:$0xf] }
  0xd9   :  { %2414 = vmatpush.bf16.msrb.mxu3 %v3836_v36  ;;  %v1627_v29 = vmax.f32 %v1351_v55, 0.0  ;;  %v4663_v36 = vld [vmem:[#allocation4 + $0x2cc] sm:$0xf0]  ;;  %v3773_v55 = vld [vmem:[#allocation4 + $0x50] sm:$0xf0]  ;;  %v1377_v26 = vadd.f32 %v4929_v6, %v1364_v14 }
  0xda   :  { %v4092_v41 = vor.u32 %v4663_v36, %v4091_v34  ;;  %v3776_v23 = vor.u32 %v4581_v15, %v3773_v55  ;;  %v3885_v34 = vld [vmem:[#allocation4 + $0x130] sm:$0xf0]  ;;  %v3987_v14 = vld [vmem:[#allocation4 + $0x1e8] sm:$0xf]  ;;  %v4636_v15 = vld [vmem:[#allocation4 + $0x1f4] sm:$0xf0] }
  0xdb   :  { %2428 = vmatpush.bf16.msrb.mxu1 %v3948_v46  ;;  %v1365_v20 = vpop.f32.mrf.mxu3  ;;  %v4659_v46 = vld [vmem:[#allocation4 + $0x2ac] sm:$0xf0] }
  0xdc   :  { %v1339_v4 = vpop.f32.mrf.mxu1  ;;  %2440 = vmatpush.bf16.msrb.mxu2 %v4092_v41  ;;  %v4076_v50 = vor.u32 %v4659_v46, %v4075_v44  ;;  %v3901_v20 = vld [vmem:[#allocation4 + $0x150] sm:$0xf0]  ;;  %v3995_v41 = vld [vmem:[#allocation4 + $0x200] sm:$0xf]  ;;  %v4665_v44 = vld [vmem:[#allocation4 + $0x2e4] sm:$0xf] }
  0xdd   :  { %2415 = vmatpush.bf16.msrb.mxu3 %v3820_v51  ;;  %v4932_v51 = vpack.c.bf16 %v1627_v29, %v1627_v29  ;;  %v4585_v4 = vld [vmem:[#allocation4 + $0x64] sm:$0xf]  ;;  %v3904_v31 = vor.u32 %v4613_v19, %v3901_v20  ;;  %v3996_v6 = vor.u32 %v4639_v42, %v3995_v41  ;;  %v4109_v46 = vld [vmem:[#allocation4 + $0x2f0] sm:$0xf0]  ;;  %v4592_v19 = vld [vmem:[#allocation4 + $0x94] sm:$0xf0] }
  0xde   :  { %3736 = vmatmul.msk.bf16.vlgmr.msra.gmra.mxu1 %vm1259_vm0, %v4867_v45  ;;  %v4601_v45 = vld [vmem:[#allocation4 + $0xe4] sm:$0xf]  ;;  %v4112_v57 = vor.u32 %v4665_v44, %v4109_v46  ;;  %v4187_v42 = vld [vmem:[#allocation4 + $0x380] sm:$0xf] }
  0xdf   :  { %2429 = vmatpush.bf16.msrb.mxu1 %v3932_v30  ;;  %v3856_v32 = vor.u32 %v4601_v45, %v3853_v21  ;;  %v4589_v30 = vld [vmem:[#allocation4 + $0x84] sm:$0xf] }
  0xe0   :  { %v1378_v28 = vpop.f32.mrf.mxu2  ;;  %2441 = vmatpush.bf16.msrb.mxu2 %v4076_v50  ;;  %v3808_v62 = vor.u32 %v4589_v30, %v3805_v56  ;;  %v3869_v50 = vld [vmem:[#allocation4 + $0x110] sm:$0xf0]  ;;  %v3843_v56 = vld [vmem:[#allocation4 + $0xc8] sm:$0xf]  ;;  %v4653_v20 = vld [vmem:[#allocation4 + $0x284] sm:$0xf] }
  0xe1   :  { %2416 = vmatpush.bf16.msrb.mxu3 %v3804_v53  ;;  %v3824_v53 = vor.u32 %v4593_v47, %v3821_v48  ;;  %v3757_v28 = vld [vmem:[#allocation4 + $0x30] sm:$0xf0]  ;;  %v4604_v48 = vld [vmem:[#allocation4 + $0xf4] sm:$0xf0] }
  0xe2   :  { %v3860_v30 = vor.u32 %v4604_v48, %v3859_v43  ;;  %v4687_v43 = vld [vmem:[#allocation4 + $0x38c] sm:$0xf0]  ;;  %v3779_v48 = vld [vmem:[#allocation4 + $0x48] sm:$0xf] }
  0xe3   :  { %2430 = vmatpush.bf16.msrb.mxu1 %v3916_v63  ;;  %v4043_v63 = vld [vmem:[#allocation4 + $0x260] sm:$0xf]  ;;  %v4188_v44 = vor.u32 %v4687_v43, %v4187_v42  ;;  %v4697_v42 = vld [vmem:[#allocation4 + $0x3e4] sm:$0xf]  ;;  %v4237_v43 = vld [vmem:[#allocation4 + $0x3f0] sm:$0xf0] }
  0xe4   :  { %2442 = vmatpush.bf16.msrb.mxu2 %v4060_v58  ;;  %v4044_v8 = vor.u32 %v4651_v0, %v4043_v63  ;;  %v4661_v58 = vld [vmem:[#allocation4 + $0x2c4] sm:$0xf]  ;;  %v4699_v63 = vld [vmem:[#allocation4 + $0x3ec] sm:$0xf0] }
  0xe5   :  { %2417 = vmatpush.bf16.msrb.mxu3 %v3788_v59  ;;  %v4621_v59 = vld [vmem:[#allocation4 + $0x184] sm:$0xf] }
  0xe6   :  { %v3936_v37 = vor.u32 %v4621_v59, %v3933_v60  ;;  %v4093_v59 = vld [vmem:[#allocation4 + $0x2d0] sm:$0xf0]  ;;  %v4600_v60 = vld [vmem:[#allocation4 + $0xd4] sm:$0xf0] }
  0xe7   :  { %2431 = vmatpush.bf16.msrb.mxu1 %v3900_v10  ;;  %v3917_v10 = vld [vmem:[#allocation4 + $0x170] sm:$0xf0] }
  0xe8   :  { %2443 = vmatpush.bf16.msrb.mxu2 %v4044_v8  ;;  %v3920_v45 = vor.u32 %v4617_v9, %v3917_v10  ;;  %v4596_v9 = vld [vmem:[#allocation4 + $0xb4] sm:$0xf0] }
  0xe9   :  { %2418 = vmatpush.bf16.msrb.mxu3 %v3772_v5  ;;  %v3789_v5 = vld [vmem:[#allocation4 + $0x70] sm:$0xf0] }
  0xea   :  { %v1389_v61 = vpop.f32.mrf.mxu0  ;;  %v3792_v11 = vor.u32 %v4585_v4, %v3789_v5  ;;  %v3827_v4 = vld [vmem:[#allocation4 + $0xa8] sm:$0xf]  ;;  %v4657_v5 = vld [vmem:[#allocation4 + $0x2a4] sm:$0xf] }
  0xeb   :  { %2432 = vmatpush.bf16.msrb.mxu1 %v3884_v17  ;;  %v1390_v36 = vadd.f32 %v1389_v61, %v1377_v26  ;;  %v4096_v61 = vor.u32 %v4661_v58, %v4093_v59  ;;  %v3971_v26 = vld [vmem:[#allocation4 + $0x1c8] sm:$0xf] }
  0xec   :  { %v3763_v59 = vld [vmem:[#allocation4 + $0x28] sm:$0xf] }
  0xed   :  { %2419 = vmatpush.bf16.msrb.mxu3 %v3756_v13  ;;  %v1402_v3 = vpop.f32.mrf.mxu1  ;;  %v4647_v13 = vld [vmem:[#allocation4 + $0x24c] sm:$0xf0] }
  0xee   :  { %v4028_v17 = vor.u32 %v4647_v13, %v4027_v12  ;;  %v1403_v52 = vadd.f32 %v1402_v3, %v1390_v36  ;;  %v3844_v3 = vor.u32 %v4600_v60, %v3843_v56  ;;  %v4695_v12 = vld [vmem:[#allocation4 + $0x3cc] sm:$0xf0]  ;;  %v4624_v56 = vld [vmem:[#allocation4 + $0x194] sm:$0xf0]  ;;  %v4641_v60 = vld [vmem:[#allocation4 + $0x224] sm:$0xf] }
  0xef   :  { %2433 = vmatpush.bf16.msrb.mxu1 %v3868_v33  ;;  %v4609_v33 = vld [vmem:[#allocation4 + $0x124] sm:$0xf] }
  0xf0   :  { %2444 = vmatpush.bf16.msrb.mxu2 %v4028_v17 }
  0xf1   :  { %2420 = vmatpush.bf16.msrb.mxu3 %v3740_v27  ;;  %v4577_v27 = vld [vmem:[#allocation4 + $0x24] sm:$0xf] }
  0xf2   :  { %v1391_v21 = vpop.f32.mrf.mxu0  ;;  %v3760_v39 = vor.u32 %v4577_v27, %v3757_v28  ;;  %v4632_v27 = vld [vmem:[#allocation4 + $0x1d4] sm:$0xf0] }
  0xf3   :  { %2478 = vmatpush.bf16.msra.mxu1 %v3984_v40  ;;  %v1415_v18 = vpop.f32.mrf.mxu3  ;;  %v3741_v40 = vld [vmem:[#allocation4 + $0x10] sm:$0xf0]  ;;  %v3988_v21 = vor.u32 %v4636_v15, %v3987_v14  ;;  %v4576_v14 = vld [vmem:[#allocation4 + $0x14] sm:$0xf0]  ;;  %v4637_v15 = vld [vmem:[#allocation4 + $0x204] sm:$0xf] }
  0xf4   :  { %2421 = vmatmul.bf16.vlgmr.msrb.gmra.mxu3 %v4932_v51  ;;  %v1416_v54 = vadd.f32 %v1415_v18, %v1403_v52  ;;  %v3828_v18 = vor.u32 %v4596_v9, %v3827_v4  ;;  %v4584_v52 = vld [vmem:[#allocation4 + $0x54] sm:$0xf0]  ;;  %v4155_v4 = vld [vmem:[#allocation4 + $0x340] sm:$0xf] }
  0xf5   :  { %2465 = vmatpush.bf16.msra.mxu3 %v3856_v32  ;;  %v1404_v29 = vpop.f32.mrf.mxu1  ;;  %v4012_v32 = vor.u32 %v4643_v7, %v4011_v24  ;;  %v4691_v24 = vld [vmem:[#allocation4 + $0x3ac] sm:$0xf0]  ;;  %v3780_v58 = vor.u32 %v4584_v52, %v3779_v48  ;;  %v3829_v52 = vld [vmem:[#allocation4 + $0xb8] sm:$0xf0] }
  0xf7   :  { %2479 = vmatpush.bf16.msra.mxu1 %v3968_v49  ;;  %2445 = vmatpush.bf16.msrb.mxu2 %v4012_v32  ;;  %v4605_v49 = vld [vmem:[#allocation4 + $0x104] sm:$0xf]  ;;  %v3795_v32 = vld [vmem:[#allocation4 + $0x68] sm:$0xf] }
  0xf8   :  { %v1428_v22 = vpop.f32.mrf.mxu2 }
  0xf9   :  { %2466 = vmatpush.bf16.msra.mxu3 %v3840_v16  ;;  %v3888_v16 = vor.u32 %v4609_v33, %v3885_v34  ;;  %v1429_v1 = vadd.f32 %v1428_v22, %v1416_v54  ;;  %v4061_v22 = vld [vmem:[#allocation4 + $0x290] sm:$0xf0]  ;;  %v4649_v33 = vld [vmem:[#allocation4 + $0x264] sm:$0xf]  ;;  %v4683_v54 = vld [vmem:[#allocation4 + $0x36c] sm:$0xf0] }
  0xfa   :  { %v4064_v28 = vor.u32 %v4653_v20, %v4061_v22  ;;  %v4045_v34 = vld [vmem:[#allocation4 + $0x270] sm:$0xf0]  ;;  %v4675_v20 = vld [vmem:[#allocation4 + $0x32c] sm:$0xf0]  ;;  %v4602_v22 = vld [vmem:[#allocation4 + $0xec] sm:$0xf] }
  0xfb   :  { %2480 = vmatpush.bf16.msra.mxu1 %v3952_v35  ;;  %v1417_v47 = vpop.f32.mrf.mxu3  ;;  %2446 = vmatpush.bf16.msrb.mxu2 %v3996_v6  ;;  %v3872_v35 = vor.u32 %v4605_v49, %v3869_v50  ;;  %v4048_v41 = vor.u32 %v4649_v33, %v4045_v34  ;;  %v4628_v6 = vld [vmem:[#allocation4 + $0x1b4] sm:$0xf0]  ;;  %v4645_v49 = vld [vmem:[#allocation4 + $0x244] sm:$0xf]  ;;  %v4029_v50 = vld [vmem:[#allocation4 + $0x250] sm:$0xf0] }
  0xfd   :  { %2467 = vmatpush.bf16.msra.mxu3 %v3824_v53  ;;  %v3744_v53 = vor.u32 %v4573_v38, %v3741_v40  ;;  %v4588_v40 = vld [vmem:[#allocation4 + $0x74] sm:$0xf0] }
  0xfe   :  { %v3796_v47 = vor.u32 %v4588_v40, %v3795_v32  ;;  %v4598_v32 = vld [vmem:[#allocation4 + $0xcc] sm:$0xf]  ;;  %v3845_v40 = vld [vmem:[#allocation4 + $0xd8] sm:$0xf0] }
  0xff   :  { %2481 = vmatpush.bf16.msra.mxu1 %v3936_v37  ;;  %2491 = vmatpush.bf16.msra.mxu2 %v4112_v57  ;;  %v4077_v37 = vld [vmem:[#allocation4 + $0x2b0] sm:$0xf0]  ;;  %v3848_v48 = vor.u32 %v4598_v32, %v3845_v40  ;;  %v3765_v40 = vld [vmem:[#allocation4 + $0x38] sm:$0xf0] }
 0x100   :  { %v1430_v25 = vpop.f32.mrf.mxu2  ;;  %v4080_v10 = vor.u32 %v4657_v5, %v4077_v37  ;;  %v4679_v5 = vld [vmem:[#allocation4 + $0x34c] sm:$0xf0]  ;;  %v3923_v37 = vld [vmem:[#allocation4 + $0x168] sm:$0xf] }
 0x101   :  { %2468 = vmatpush.bf16.msra.mxu3 %v3808_v62  ;;  %v4235_v62 = vld [vmem:[#allocation4 + $0x3e0] sm:$0xf]  ;;  %v4156_v9 = vor.u32 %v4679_v5, %v4155_v4  ;;  %v4630_v5 = vld [vmem:[#allocation4 + $0x1cc] sm:$0xf] }
 0x102   :  { %v4236_v0 = vor.u32 %v4699_v63, %v4235_v62  ;;  %v4171_v25 = vld [vmem:[#allocation4 + $0x360] sm:$0xf] }
 0x103   :  { %2482 = vmatpush.bf16.msra.mxu1 %v3920_v45  ;;  %2492 = vmatpush.bf16.msra.mxu2 %v4096_v61  ;;  %v1441_v8 = vpop.f32.mrf.mxu3  ;;  %v3811_v45 = vld [vmem:[#allocation4 + $0x88] sm:$0xf]  ;;  %v4013_v61 = vld [vmem:[#allocation4 + $0x230] sm:$0xf0] }
 0x104   :  { %2452 = vmatpush.bf16.msrb.mxu0 %v4236_v0  ;;  %v1442_v13 = vadd.f32 %v1441_v8, %v1429_v1  ;;  %v3812_v29 = vor.u32 %v4592_v19, %v3811_v45  ;;  %v4580_v1 = vld [vmem:[#allocation4 + $0x34] sm:$0xf0]  ;;  %v4139_v19 = vld [vmem:[#allocation4 + $0x320] sm:$0xf] }
 0x105   :  { %2469 = vmatpush.bf16.msra.mxu3 %v3792_v11  ;;  %v4219_v11 = vld [vmem:[#allocation4 + $0x3c0] sm:$0xf]  ;;  %v4620_v8 = vld [vmem:[#allocation4 + $0x174] sm:$0xf0] }
 0x106   :  { %v4220_v55 = vor.u32 %v4695_v12, %v4219_v11  ;;  %v1628_v17 = vmax.f32 %v1442_v13, 0.0  ;;  %v3747_v11 = vld [vmem:[#allocation4 + $0x8] sm:$0xf]  ;;  %v3764_v13 = vor.u32 %v4580_v1, %v3763_v59  ;;  %v3924_v45 = vor.u32 %v4620_v8, %v3923_v37  ;;  %v4689_v1 = vld [vmem:[#allocation4 + $0x3a4] sm:$0xf] }
 0x107   :  { %2483 = vmatpush.bf16.msra.mxu1 %v3904_v31  ;;  %2493 = vmatpush.bf16.msra.mxu2 %v4080_v10 }
 0x108   :  { %2453 = vmatpush.bf16.msrb.mxu0 %v4220_v55  ;;  %v4939_v7 = vpack.c.bf16 %v1628_v17, %v1628_v17  ;;  %v3997_v55 = vld [vmem:[#allocation4 + $0x210] sm:$0xf0]  ;;  %v3907_v17 = vld [vmem:[#allocation4 + $0x148] sm:$0xf] }
 0x109   :  { %2470 = vmatpush.bf16.msra.mxu3 %v3776_v23  ;;  %v4203_v23 = vld [vmem:[#allocation4 + $0x3a0] sm:$0xf] }
 0x10a   :  { %v4204_v31 = vor.u32 %v4691_v24, %v4203_v23  ;;  %2434 = vmatmul.bf16.vlgmr.msrb.gmra.mxu1 %v4939_v7  ;;  %v4942_v38 = vpop.f32.mrf.mxu0  ;;  %v3861_v23 = vld [vmem:[#allocation4 + $0xf8] sm:$0xf0]  ;;  %v4140_v24 = vor.u32 %v4675_v20, %v4139_v19  ;;  %v4582_v19 = vld [vmem:[#allocation4 + $0x4c] sm:$0xf] }
 0x10b   :  { %2484 = vmatpush.bf16.msra.mxu1 %v3888_v16  ;;  %v1443_v36 = vpop.f32.mrf.mxu3  ;;  %2494 = vmatpush.bf16.msra.mxu2 %v4064_v28  ;;  %v3955_v16 = vld [vmem:[#allocation4 + $0x1a8] sm:$0xf]  ;;  %v4612_v28 = vld [vmem:[#allocation4 + $0x134] sm:$0xf0] }
 0x10c   :  { %2454 = vmatpush.bf16.msrb.mxu0 %v4204_v31  ;;  %v3956_v57 = vor.u32 %v4628_v6, %v3955_v16  ;;  %v4123_v36 = vld [vmem:[#allocation4 + $0x300] sm:$0xf]  ;;  %v273_v16 = vperm.slane %v4912_v2, 2 }
 0x10d   :  { %2471 = vmatpush.bf16.msra.mxu3 %v3760_v39  ;;  %v3972_v39 = vor.u32 %v4632_v27, %v3971_v26  ;;  %v4944_v46 = vpop.f32.mrf.mxu1  ;;  %v3748_v26 = vor.u32 %v4576_v14, %v3747_v11  ;;  %v3891_v27 = vld [vmem:[#allocation4 + $0x128] sm:$0xf]  ;;  %v4586_v11 = vld [vmem:[#allocation4 + $0x6c] sm:$0xf]  ;;  %v4685_v14 = vld [vmem:[#allocation4 + $0x384] sm:$0xf] }
 0x10f   :  { %2485 = vmatpush.bf16.msra.mxu1 %v3872_v35  ;;  %2495 = vmatpush.bf16.msra.mxu2 %v4048_v41  ;;  %v4172_v35 = vor.u32 %v4683_v54, %v4171_v25  ;;  %v4221_v25 = vld [vmem:[#allocation4 + $0x3d0] sm:$0xf0]  ;;  %v1455_v54 = vadd.f32 %v4944_v46, %v273_v16  ;;  %v3973_v46 = vld [vmem:[#allocation4 + $0x1d8] sm:$0xf0]  ;;  %v4618_v16 = vld [vmem:[#allocation4 + $0x16c] sm:$0xf] }
 0x110   :  { %2455 = vmatpush.bf16.msrb.mxu0 %v4188_v44  ;;  %v4240_v44 = vor.u32 %v4697_v42, %v4237_v43  ;;  %v4157_v42 = vld [vmem:[#allocation4 + $0x350] sm:$0xf0] }
 0x111   :  { %2472 = vmatpush.bf16.msra.mxu3 %v3744_v53  ;;  %v4032_v53 = vor.u32 %v4645_v49, %v4029_v50  ;;  %v3875_v49 = vld [vmem:[#allocation4 + $0x108] sm:$0xf]  ;;  %v4608_v50 = vld [vmem:[#allocation4 + $0x114] sm:$0xf0] }
 0x112   :  { %v1482_v63 = vpop.f32.mrf.mxu0 }
 0x113   :  { %2530 = vmatpush.bf16.msrb.mxu1 %v3988_v21  ;;  %2496 = vmatpush.bf16.msra.mxu2 %v4032_v53  ;;  %v4616_v21 = vld [vmem:[#allocation4 + $0x154] sm:$0xf0]  ;;  %v4693_v53 = vld [vmem:[#allocation4 + $0x3c4] sm:$0xf] }
 0x114   :  { %2473 = vmatmul.bf16.vlgmr.msra.gmra.mxu3 %v4932_v51  ;;  %2456 = vmatpush.bf16.msrb.mxu0 %v4172_v35  ;;  %v3908_v31 = vor.u32 %v4616_v21, %v3907_v17  ;;  %v4224_v35 = vor.u32 %v4693_v53, %v4221_v25  ;;  %v3957_v17 = vld [vmem:[#allocation4 + $0x1b8] sm:$0xf0]  ;;  %v4673_v25 = vld [vmem:[#allocation4 + $0x324] sm:$0xf] }
 0x115   :  { %2517 = vmatpush.bf16.msrb.mxu3 %v3860_v30  ;;  %v3939_v30 = vld [vmem:[#allocation4 + $0x188] sm:$0xf]  ;;  %v1456_v12 = vpop.f32.mrf.mxu1  ;;  %v3781_v21 = vld [vmem:[#allocation4 + $0x58] sm:$0xf0] }
 0x116   :  { %v3940_v0 = vor.u32 %v4624_v56, %v3939_v30  ;;  %v4634_v30 = vld [vmem:[#allocation4 + $0x1ec] sm:$0xf]  ;;  %v3989_v56 = vld [vmem:[#allocation4 + $0x1f8] sm:$0xf0]  ;;  %v3976_v12 = vor.u32 %v4630_v5, %v3973_v46  ;;  %v4125_v5 = vld [vmem:[#allocation4 + $0x310] sm:$0xf0] }
 0x117   :  { %2531 = vmatpush.bf16.msrb.mxu1 %v3972_v39  ;;  %v4946_v62 = vpop.f32.mrf.mxu3  ;;  %v4671_v39 = vld [vmem:[#allocation4 + $0x30c] sm:$0xf0]  ;;  %v3992_v63 = vor.u32 %v4634_v30, %v3989_v56  ;;  %v3749_v53 = vld [vmem:[#allocation4 + $0x18] sm:$0xf0]  ;;  %v4614_v56 = vld [vmem:[#allocation4 + $0x14c] sm:$0xf] }
 0x118   :  { %v4948_v10 = vpop.f32.mrf.mxu2  ;;  %2457 = vmatpush.bf16.msrb.mxu0 %v4156_v9  ;;  %v4124_v41 = vor.u32 %v4671_v39, %v4123_v36  ;;  %v1468_v4 = vadd.f32 %v4946_v62, %v1455_v54  ;;  %v4141_v54 = vld [vmem:[#allocation4 + $0x330] sm:$0xf0]  ;;  %v4610_v46 = vld [vmem:[#allocation4 + $0x12c] sm:$0xf] }
 0x119   :  { %2518 = vmatpush.bf16.msrb.mxu3 %v3844_v3  ;;  %v4016_v3 = vor.u32 %v4641_v60, %v4013_v61  ;;  %v4590_v60 = vld [vmem:[#allocation4 + $0x8c] sm:$0xf] }
 0x11a   :  { %2486 = vmatmul.bf16.vlgmr.msra.gmra.mxu1 %v4939_v7  ;;  %v4951_v34 = vpop.f32.mrf.mxu0 }
 0x11b   :  { %2532 = vmatpush.bf16.msrb.mxu1 %v3956_v57  ;;  %2497 = vmatpush.bf16.msra.mxu2 %v4016_v3  ;;  %v4594_v57 = vld [vmem:[#allocation4 + $0xac] sm:$0xf]  ;;  %v4205_v3 = vld [vmem:[#allocation4 + $0x3b0] sm:$0xf0] }
 0x11c   :  { %2458 = vmatpush.bf16.msrb.mxu0 %v4140_v24  ;;  %v3832_v59 = vor.u32 %v4594_v57, %v3829_v52  ;;  %v4208_v37 = vor.u32 %v4689_v1, %v4205_v3  ;;  %v4574_v57 = vld [vmem:[#allocation4 + $0xc] sm:$0xf] }
 0x11d   :  { %2519 = vmatpush.bf16.msrb.mxu3 %v3828_v18  ;;  %v4000_v18 = vor.u32 %v4637_v15, %v3997_v55  ;;  %v4189_v15 = vld [vmem:[#allocation4 + $0x390] sm:$0xf0]  ;;  %v1481_v55 = vadd.f32 %v4942_v38, %v1468_v4  ;;  %v4669_v4 = vld [vmem:[#allocation4 + $0x304] sm:$0xf] }
 0x11e   :  { %v4192_v62 = vor.u32 %v4685_v14, %v4189_v15  ;;  %v4606_v15 = vld [vmem:[#allocation4 + $0x10c] sm:$0xf] }
 0x11f   :  { %2533 = vmatpush.bf16.msrb.mxu1 %v3940_v0  ;;  %v1469_v33 = vpop.f32.mrf.mxu3  ;;  %2498 = vmatpush.bf16.msra.mxu2 %v4000_v18  ;;  %v3813_v0 = vld [vmem:[#allocation4 + $0x98] sm:$0xf0]  ;;  %v1494_v24 = vadd.f32 %v4948_v10, %v1481_v55 }
 0x120   :  { %v1495_v6 = vpop.f32.mrf.mxu2  ;;  %2459 = vmatpush.bf16.msrb.mxu0 %v4124_v41  ;;  %v3816_v9 = vor.u32 %v4590_v60, %v3813_v0  ;;  %v4578_v33 = vld [vmem:[#allocation4 + $0x2c] sm:$0xf]  ;;  %v4677_v41 = vld [vmem:[#allocation4 + $0x344] sm:$0xf]  ;;  %v3925_v10 = vld [vmem:[#allocation4 + $0x178] sm:$0xf0] }
 0x121   :  { %2520 = vmatpush.bf16.msrb.mxu3 %v3812_v29  ;;  %v3864_v29 = vor.u32 %v4602_v22, %v3861_v23  ;;  %v4681_v22 = vld [vmem:[#allocation4 + $0x364] sm:$0xf]  ;;  %v4173_v23 = vld [vmem:[#allocation4 + $0x370] sm:$0xf0]  ;;  %v3928_v52 = vor.u32 %v4618_v16, %v3925_v10  ;;  %v4664_v0 = vld [vmem:[#allocation4 + $0x2d4] sm:$0xf0] }
 0x122   :  { %v1534_v61 = vpop.f32.mrf.mxu0  ;;  %v4176_v38 = vor.u32 %v4681_v22, %v4173_v23  ;;  %v3877_v55 = vld [vmem:[#allocation4 + $0x118] sm:$0xf0]  ;;  %v4652_v22 = vld [vmem:[#allocation4 + $0x274] sm:$0xf0]  ;;  %v4666_v10 = vld [vmem:[#allocation4 + $0x2ec] sm:$0xf] }
 0x123   :  { %2534 = vmatpush.bf16.msrb.mxu1 %v3924_v45  ;;  %v4626_v45 = vld [vmem:[#allocation4 + $0x1ac] sm:$0xf] }
 0x124   :  { %2504 = vmatpush.bf16.msra.mxu0 %v4240_v44  ;;  %v3960_v20 = vor.u32 %v4626_v45, %v3957_v17  ;;  %v4160_v44 = vor.u32 %v4677_v41, %v4157_v42  ;;  %v4067_v17 = vld [vmem:[#allocation4 + $0x288] sm:$0xf] }
 0x125   :  { %2521 = vmatpush.bf16.msrb.mxu3 %v3796_v47  ;;  %v3892_v47 = vor.u32 %v4612_v28, %v3891_v27  ;;  %v3941_v27 = vld [vmem:[#allocation4 + $0x198] sm:$0xf0] }
 0x127   :  { %2535 = vmatpush.bf16.msrb.mxu1 %v3908_v31 }
 0x128   :  { %2505 = vmatpush.bf16.msra.mxu0 %v4224_v35  ;;  %v3909_v35 = vld [vmem:[#allocation4 + $0x158] sm:$0xf0] }
 0x129   :  { %2522 = vmatpush.bf16.msrb.mxu3 %v3780_v58  ;;  %v3876_v58 = vor.u32 %v4608_v50, %v3875_v49  ;;  %v4115_v49 = vld [vmem:[#allocation4 + $0x2e8] sm:$0xf]  ;;  %v4668_v50 = vld [vmem:[#allocation4 + $0x2f4] sm:$0xf0]  ;;  %v3912_v1 = vor.u32 %v4614_v56, %v3909_v35 }
 0x12a   :  { %v4116_v60 = vor.u32 %v4668_v50, %v4115_v49  ;;  %v4662_v50 = vld [vmem:[#allocation4 + $0x2cc] sm:$0xf] }
 0x12b   :  { %2536 = vmatpush.bf16.msrb.mxu1 %v3892_v47  ;;  %v1506_v8 = vpop.f32.mrf.mxu1 }
 0x12c   :  { %2506 = vmatpush.bf16.msra.mxu0 %v4208_v37  ;;  %v1507_v31 = vadd.f32 %v1506_v8, %v1494_v24  ;;  %v3893_v37 = vld [vmem:[#allocation4 + $0x138] sm:$0xf0] }
 0x12d   :  { %2523 = vmatpush.bf16.msrb.mxu3 %v3764_v13  ;;  %v3797_v13 = vld [vmem:[#allocation4 + $0x78] sm:$0xf0]  ;;  %v3896_v14 = vor.u32 %v4610_v46, %v3893_v37  ;;  %v4211_v37 = vld [vmem:[#allocation4 + $0x3a8] sm:$0xf] }
 0x12e   :  { %v3800_v18 = vor.u32 %v4586_v11, %v3797_v13  ;;  %v4660_v13 = vld [vmem:[#allocation4 + $0x2b4] sm:$0xf0]  ;;  %v4069_v46 = vld [vmem:[#allocation4 + $0x298] sm:$0xf0] }
 0x12f   :  { %2537 = vmatpush.bf16.msrb.mxu1 %v3876_v58  ;;  %v4960_v28 = vpop.f32.mrf.mxu0 }
 0x130   :  { %2507 = vmatpush.bf16.msra.mxu0 %v4192_v62  ;;  %v4656_v62 = vld [vmem:[#allocation4 + $0x294] sm:$0xf0] }
 0x131   :  { %2524 = vmatpush.bf16.msrb.mxu3 %v3748_v26  ;;  %v4622_v26 = vld [vmem:[#allocation4 + $0x18c] sm:$0xf] }
 0x132   :  { %2538 = vmatmul.bf16.vlgmr.msrb.gmra.mxu1 %v4939_v7  ;;  %v3944_v39 = vor.u32 %v4622_v26, %v3941_v27  ;;  %v4035_v27 = vld [vmem:[#allocation4 + $0x248] sm:$0xf] }
 0x133   :  { %2582 = vmatpush.bf16.msra.mxu1 %v3992_v63  ;;  %v1508_v32 = vpop.f32.mrf.mxu1  ;;  %v4099_v63 = vld [vmem:[#allocation4 + $0x2c8] sm:$0xf] }
 0x134   :  { %2525 = vmatmul.bf16.vlgmr.msrb.gmra.mxu3 %v4932_v51  ;;  %2508 = vmatpush.bf16.msra.mxu0 %v4176_v38  ;;  %v4100_v11 = vor.u32 %v4664_v0, %v4099_v63  ;;  %v4644_v32 = vld [vmem:[#allocation4 + $0x234] sm:$0xf0]  ;;  %v4227_v63 = vld [vmem:[#allocation4 + $0x3c8] sm:$0xf] }
 0x135   :  { %2569 = vmatpush.bf16.msra.mxu3 %v3864_v29  ;;  %v3784_v29 = vor.u32 %v4582_v19, %v3781_v21  ;;  %v3880_v19 = vor.u32 %v4606_v15, %v3877_v55  ;;  %v4051_v21 = vld [vmem:[#allocation4 + $0x268] sm:$0xf]  ;;  %v4696_v0 = vld [vmem:[#allocation4 + $0x3d4] sm:$0xf0] }
 0x136   :  { %v4052_v26 = vor.u32 %v4652_v22, %v4051_v21  ;;  %v4688_v15 = vld [vmem:[#allocation4 + $0x394] sm:$0xf0]  ;;  %v4642_v22 = vld [vmem:[#allocation4 + $0x22c] sm:$0xf] }
 0x137   :  { %2583 = vmatpush.bf16.msra.mxu1 %v3976_v12  ;;  %v1519_v36 = vpop.f32.mrf.mxu3  ;;  %v1560_v58 = vpop.f32.mrf.mxu0  ;;  %v4083_v12 = vld [vmem:[#allocation4 + $0x2a8] sm:$0xf] }
 0x138   :  { %v1520_v43 = vadd.f32 %v1519_v36, %v1507_v31  ;;  %v1545_v6 = vpop.f32.mrf.mxu2  ;;  %2509 = vmatpush.bf16.msra.mxu0 %v4160_v44  ;;  %v4084_v45 = vor.u32 %v4660_v13, %v4083_v12  ;;  %v4650_v12 = vld [vmem:[#allocation4 + $0x26c] sm:$0xf]  ;;  %v4053_v13 = vld [vmem:[#allocation4 + $0x278] sm:$0xf0] }
 0x139   :  { %2570 = vmatpush.bf16.msra.mxu3 %v3848_v48  ;;  %v3768_v48 = vor.u32 %v4578_v33, %v3765_v40  ;;  %v4056_v55 = vor.u32 %v4650_v12, %v4053_v13 }
 0x13a   :  { %v1533_v47 = vadd.f32 %v4951_v34, %v1520_v43  ;;  %v3752_v34 = vor.u32 %v4574_v57, %v3749_v53  ;;  %v4003_v43 = vld [vmem:[#allocation4 + $0x208] sm:$0xf]  ;;  %v4101_v57 = vld [vmem:[#allocation4 + $0x2d8] sm:$0xf0] }
 0x13b   :  { %2584 = vmatpush.bf16.msra.mxu1 %v3960_v20  ;;  %v4068_v20 = vor.u32 %v4656_v62, %v4067_v17  ;;  %v4104_v35 = vor.u32 %v4662_v50, %v4101_v57  ;;  %v4646_v17 = vld [vmem:[#allocation4 + $0x24c] sm:$0xf]  ;;  %v4037_v62 = vld [vmem:[#allocation4 + $0x258] sm:$0xf0]  ;;  %v4981_v57 = vld [vmem:[%s5106_s4] sm:$0xf] }
 0x13c   :  { %v1629_v30 = vmax.f32 %v1533_v47, 0.0  ;;  %v4197_v50 = vld [vmem:[#allocation4 + $0x398] sm:$0xf0] }
 0x13d   :  { %2571 = vmatpush.bf16.msra.mxu3 %v3832_v59  ;;  %v4144_v59 = vor.u32 %v4673_v25, %v4141_v54  ;;  %v4243_v25 = vld [vmem:[#allocation4 + $0x3e8] sm:$0xf]  ;;  %v4700_v54 = vld [vmem:[#allocation4 + $0x3f4] sm:$0xf0] }
 0x13e   :  { %v4963_v61 = vpack.c.bf16 %v1629_v30, %v1629_v30  ;;  %v4244_v58 = vor.u32 %v4700_v54, %v4243_v25  ;;  %v4181_v25 = vld [vmem:[#allocation4 + $0x378] sm:$0xf0] }
 0x13f   :  { %2585 = vmatpush.bf16.msra.mxu1 %v3944_v39  ;;  %v1521_v3 = vpop.f32.mrf.mxu3  ;;  %2510 = vmatpush.bf16.msra.mxu0 %v4144_v59  ;;  %v4658_v59 = vld [vmem:[#allocation4 + $0x2ac] sm:$0xf] }
 0x140   :  { %2447 = vmatmul.bf16.vlgmr.msrb.gmra.mxu2 %v4963_v61  ;;  %v1547_v8 = vpop.f32.mrf.mxu2 }
 0x141   :  { %2572 = vmatpush.bf16.msra.mxu3 %v3816_v9  ;;  %v4128_v9 = vor.u32 %v4669_v4, %v4125_v5  ;;  %2543 = vmatpush.bf16.msrb.mxu2 %v4116_v60  ;;  %v4085_v60 = vld [vmem:[#allocation4 + $0x2b8] sm:$0xf0]  ;;  %v4228_v4 = vor.u32 %v4696_v0, %v4227_v63  ;;  %v4654_v5 = vld [vmem:[#allocation4 + $0x28c] sm:$0xf]  ;;  %v4692_v8 = vld [vmem:[#allocation4 + $0x3b4] sm:$0xf0] }
 0x142   :  { %v4674_v0 = vld [vmem:[#allocation4 + $0x32c] sm:$0xf] }
 0x143   :  { %2586 = vmatpush.bf16.msra.mxu1 %v3928_v52  ;;  %2511 = vmatpush.bf16.msra.mxu0 %v4128_v9  ;;  %v4072_v9 = vor.u32 %v4654_v5, %v4069_v46  ;;  %v4133_v5 = vld [vmem:[#allocation4 + $0x318] sm:$0xf0] }
 0x145   :  { %2573 = vmatpush.bf16.msra.mxu3 %v3800_v18  ;;  %2544 = vmatpush.bf16.msrb.mxu2 %v4100_v11  ;;  %v274_v18 = vperm.slane %v4912_v2, 3  ;;  %v4212_v11 = vor.u32 %v4692_v8, %v4211_v37 }
 0x147   :  { %2587 = vmatpush.bf16.msra.mxu1 %v3912_v1  ;;  %v1546_v23 = vadd.f32 %v1545_v6, %v274_v18  ;;  %v4117_v6 = vld [vmem:[#allocation4 + $0x2f8] sm:$0xf0]  ;;  %v4088_v1 = vor.u32 %v4658_v59, %v4085_v60  ;;  %v4179_v18 = vld [vmem:[#allocation4 + $0x368] sm:$0xf] }
 0x149   :  { %2574 = vmatpush.bf16.msra.mxu3 %v3784_v29  ;;  %2545 = vmatpush.bf16.msrb.mxu2 %v4084_v45  ;;  %v1559_v38 = vadd.f32 %v4960_v28, %v1546_v23  ;;  %v4019_v29 = vld [vmem:[#allocation4 + $0x228] sm:$0xf]  ;;  %v4021_v23 = vld [vmem:[#allocation4 + $0x238] sm:$0xf0] }
 0x14a   :  { %v4020_v42 = vor.u32 %v4644_v32, %v4019_v29  ;;  %v4147_v29 = vld [vmem:[#allocation4 + $0x328] sm:$0xf]  ;;  %v4676_v32 = vld [vmem:[#allocation4 + $0x334] sm:$0xf0] }
 0x14b   :  { %2588 = vmatpush.bf16.msra.mxu1 %v3896_v14  ;;  %v1571_v24 = vpop.f32.mrf.mxu1  ;;  %v4195_v14 = vld [vmem:[#allocation4 + $0x388] sm:$0xf] }
 0x14c   :  { %v1572_v33 = vadd.f32 %v1571_v24, %v1559_v38  ;;  %v4196_v45 = vor.u32 %v4688_v15, %v4195_v14  ;;  %v4163_v24 = vld [vmem:[#allocation4 + $0x348] sm:$0xf]  ;;  %v4708_v14 = vld [vmem:[%s5107_s5 + $0x38] sm:$0xff] }
 0x14d   :  { %2575 = vmatpush.bf16.msra.mxu3 %v3768_v48  ;;  %2546 = vmatpush.bf16.msrb.mxu2 %v4068_v20  ;;  %v4120_v48 = vor.u32 %v4666_v10, %v4117_v6  ;;  %v4040_v20 = vor.u32 %v4646_v17, %v4037_v62  ;;  %v4694_v10 = vld [vmem:[#allocation4 + $0x3cc] sm:$0xf]  ;;  %v4229_v6 = vld [vmem:[#allocation4 + $0x3d8] sm:$0xf0] }
 0x14f   :  { %2589 = vmatpush.bf16.msra.mxu1 %v3880_v19  ;;  %v1610_v2 = vpop.f32.mrf.mxu0  ;;  %v4684_v19 = vld [vmem:[#allocation4 + $0x374] sm:$0xf0] }
 0x150   :  { %2499 = vmatmul.bf16.vlgmr.msra.gmra.mxu2 %v4963_v61  ;;  %v4180_v21 = vor.u32 %v4684_v19, %v4179_v18  ;;  %v4706_v18 = vld [vmem:[%s5107_s5 + $0x28] sm:$0xff] }
 0x151   :  { %2576 = vmatpush.bf16.msra.mxu3 %v3752_v34  ;;  %2547 = vmatpush.bf16.msrb.mxu2 %v4052_v26  ;;  %v4680_v26 = vld [vmem:[#allocation4 + $0x354] sm:$0xf0] }
 0x152   :  { %2590 = vmatmul.bf16.vlgmr.msra.gmra.mxu1 %v4939_v7  ;;  %v4640_v7 = vld [vmem:[#allocation4 + $0x214] sm:$0xf0]  ;;  %v4164_v38 = vor.u32 %v4680_v26, %v4163_v24  ;;  %v4703_v26 = vld [vmem:[%s5107_s5 + $0x10] sm:$0xff] }
 0x153   :  { %v1573_v36 = vpop.f32.mrf.mxu1  ;;  %v4004_v47 = vor.u32 %v4640_v7, %v4003_v43  ;;  %v4245_v43 = vld [vmem:[#allocation4 + $0x3f8] sm:$0xf0] }
 0x154   :  { %2577 = vmatmul.bf16.vlgmr.msra.gmra.mxu3 %v4932_v51  ;;  %v4648_v51 = vld [vmem:[#allocation4 + $0x254] sm:$0xf0]  ;;  %v4148_v36 = vor.u32 %v4676_v32, %v4147_v29  ;;  %v1768_v32 = vperm.slane %v4981_v57, 3 }
 0x155   :  { %v4036_v31 = vor.u32 %v4648_v51, %v4035_v27  ;;  %v4024_v51 = vor.u32 %v4642_v22, %v4021_v23  ;;  %2889 = vmatpush.bf16.msrb.mxu3 %v4708_v14  ;;  %v4704_v22 = vld [vmem:[%s5107_s5 + $0x18] sm:$0xff] }
 0x156   :  { %v4716_v23 = vld [vmem:[%s5107_s5 + $0x78] sm:$0xff] }
 0x157   :  { %v1584_v39 = vpop.f32.mrf.mxu3  ;;  %2548 = vmatpush.bf16.msrb.mxu2 %v4036_v31  ;;  %v1612_v28 = vpop.f32.mrf.mxu0  ;;  %v4005_v31 = vld [vmem:[#allocation4 + $0x218] sm:$0xf0]  ;;  %2902 = vmatpush.bf16.msrb.mxu1 %v4716_v23 }
 0x158   :  { %v1585_v40 = vadd.f32 %v1584_v39, %v1572_v33  ;;  %v1597_v41 = vpop.f32.mrf.mxu2  ;;  %v4131_v39 = vld [vmem:[#allocation4 + $0x308] sm:$0xf]  ;;  %v4232_v28 = vor.u32 %v4694_v10, %v4229_v6 }
 0x159   :  { %v4710_v10 = vld [vmem:[%s5107_s5 + $0x48] sm:$0xff] }
 0x15a   :  { %v1598_v16 = vadd.f32 %v1597_v41, %v1585_v40  ;;  %v4672_v40 = vld [vmem:[#allocation4 + $0x314] sm:$0xf0]  ;;  %v4722_v6 = vld [vmem:[%s5107_s5 + $0xa8] sm:$0xff] }
 0x15b   :  { %2549 = vmatpush.bf16.msrb.mxu2 %v4020_v42  ;;  %v1623_v49 = vpop.f32.mrf.mxu1  ;;  %v4698_v42 = vld [vmem:[#allocation4 + $0x3ec] sm:$0xf]  ;;  %v4132_v7 = vor.u32 %v4672_v40, %v4131_v39 }
 0x15c   :  { %v1611_v44 = vadd.f32 %v1610_v2, %v1598_v16  ;;  %v4638_v2 = vld [vmem:[#allocation4 + $0x20c] sm:$0xf]  ;;  %v4248_v16 = vor.u32 %v4698_v42, %v4245_v43  ;;  %v4723_v42 = vld [vmem:[%s5107_s5 + $0xb0] sm:$0xff] }
 0x15d   :  { %v4008_v33 = vor.u32 %v4638_v2, %v4005_v31  ;;  %v4701_v2 = vld [vmem:[%s5107_s5] sm:$0xff] }
 0x15e   :  { %v1624_v52 = vadd.f32 %v1623_v49, %v1611_v44  ;;  %v4690_v44 = vld [vmem:[#allocation4 + $0x3ac] sm:$0xf]  ;;  %v4713_v31 = vld [vmem:[%s5107_s5 + $0x60] sm:$0xff] }
 0x15f   :  { %v1586_v53 = vpop.f32.mrf.mxu3  ;;  %2550 = vmatpush.bf16.msrb.mxu2 %v4004_v47  ;;  %v4213_v47 = vld [vmem:[#allocation4 + $0x3b8] sm:$0xf0]  ;;  %v4686_v49 = vld [vmem:[#allocation4 + $0x38c] sm:$0xf] }
 0x160   :  { %v1599_v30 = vpop.f32.mrf.mxu2  ;;  %v1630_v56 = vmax.f32 %v1624_v52, 0.0  ;;  %v1765_v52 = vperm.slane %v4981_v57, 0  ;;  %v4682_v53 = vld [vmem:[#allocation4 + $0x36c] sm:$0xf] }
 0x161   :  { %v4184_v54 = vor.u32 %v4682_v53, %v4181_v25  ;;  %v4718_v53 = vld [vmem:[%s5107_s5 + $0x88] sm:$0xff] }
 0x162   :  { %v4971_v34 = vpack.c.bf16 %v1630_v56, %v1630_v56  ;;  %2551 = vmatmul.bf16.vlgmr.msrb.gmra.mxu2 %v4963_v61  ;;  %v4678_v56 = vld [vmem:[#allocation4 + $0x34c] sm:$0xf] }
 0x163   :  { %2595 = vmatpush.bf16.msra.mxu2 %v4120_v48  ;;  %v1625_v3 = vpop.f32.mrf.mxu1  ;;  %v4216_v48 = vor.u32 %v4690_v44, %v4213_v47  ;;  %v4709_v44 = vld [vmem:[%s5107_s5 + $0x40] sm:$0xff] }
 0x164   :  { %2460 = vmatmul.bf16.vlgmr.msrb.gmra.mxu0 %v4971_v34  ;;  %v4721_v47 = vld [vmem:[%s5107_s5 + $0xa0] sm:$0xff] }
 0x165   :  { %2556 = vmatpush.bf16.msrb.mxu0 %v4244_v58 }
 0x167   :  { %2596 = vmatpush.bf16.msra.mxu2 %v4104_v35  ;;  %v4165_v35 = vld [vmem:[#allocation4 + $0x358] sm:$0xf0] }
 0x168   :  { %v4168_v63 = vor.u32 %v4678_v56, %v4165_v35  ;;  %v4717_v56 = vld [vmem:[%s5107_s5 + $0x80] sm:$0xff]  ;;  %v4732_v35 = vld [vmem:[%s5107_s5 + $0xf8] sm:$0xff] }
 0x169   :  { %2557 = vmatpush.bf16.msrb.mxu0 %v4228_v4  ;;  %v4670_v4 = vld [vmem:[#allocation4 + $0x30c] sm:$0xf] }
 0x16a   :  { %v4136_v8 = vor.u32 %v4670_v4, %v4133_v5 }
 0x16b   :  { %2597 = vmatpush.bf16.msra.mxu2 %v4088_v1  ;;  %v4149_v1 = vld [vmem:[#allocation4 + $0x338] sm:$0xf0] }
 0x16c   :  { %v4152_v3 = vor.u32 %v4674_v0, %v4149_v1  ;;  %v4730_v0 = vld [vmem:[%s5107_s5 + $0xe8] sm:$0xff] }
 0x16d   :  { %2558 = vmatpush.bf16.msrb.mxu0 %v4212_v11 }
 0x16f   :  { %2598 = vmatpush.bf16.msra.mxu2 %v4072_v9  ;;  %v1766_v9 = vperm.slane %v4981_v57, 1 }
 0x171   :  { %2559 = vmatpush.bf16.msrb.mxu0 %v4196_v45  ;;  %v4707_v45 = vld [vmem:[%s5107_s5 + $0x30] sm:$0xff] }
 0x172   :  { %2890 = vmatpush.bf16.msrb.mxu3 %v4707_v45 }
 0x173   :  { %2599 = vmatpush.bf16.msra.mxu2 %v4056_v55  ;;  %v1767_v55 = vperm.slane %v4981_v57, 2  ;;  %v4719_v57 = vld [vmem:[%s5107_s5 + $0x90] sm:$0xff] }
 0x174   :  { %2512 = vmatmul.bf16.vlgmr.msra.gmra.mxu0 %v4971_v34 }
 0x175   :  { %2560 = vmatpush.bf16.msrb.mxu0 %v4180_v21 }
 0x176   :  { %2891 = vmatpush.bf16.msrb.mxu3 %v4706_v18 }
 0x177   :  { %v2422_v27 = vpop.f32.mrf.mxu3  ;;  %2600 = vmatpush.bf16.msra.mxu2 %v4040_v20  ;;  %v4705_v20 = vld [vmem:[%s5107_s5 + $0x20] sm:$0xff] }
 0x178   :  { %v2423_v30 = vadd.f32 %v2422_v27, %v1765_v52  ;;  %v4715_v27 = vld [vmem:[%s5107_s5 + $0x70] sm:$0xff] }
 0x179   :  { %2561 = vmatpush.bf16.msrb.mxu0 %v4164_v38  ;;  %2903 = vmatpush.bf16.msrb.mxu1 %v4715_v27  ;;  %v4714_v38 = vld [vmem:[%s5107_s5 + $0x68] sm:$0xff] }
 0x17a   :  { %2892 = vmatpush.bf16.msrb.mxu3 %v4705_v20 }
 0x17b   :  { %2601 = vmatpush.bf16.msra.mxu2 %v4024_v51  ;;  %v4702_v51 = vld [vmem:[%s5107_s5 + $0x8] sm:$0xff] }
 0x17d   :  { %2562 = vmatpush.bf16.msrb.mxu0 %v4148_v36  ;;  %2904 = vmatpush.bf16.msrb.mxu1 %v4714_v38  ;;  %v4724_v36 = vld [vmem:[%s5107_s5 + $0xb8] sm:$0xff] }
 0x17e   :  { %2893 = vmatpush.bf16.msrb.mxu3 %v4704_v22 }
 0x17f   :  { %v2424_v41 = vpop.f32.mrf.mxu3  ;;  %2602 = vmatpush.bf16.msra.mxu2 %v4008_v33  ;;  %v4712_v33 = vld [vmem:[%s5107_s5 + $0x58] sm:$0xff] }
 0x180   :  { %v4711_v41 = vld [vmem:[%s5107_s5 + $0x50] sm:$0xff] }
 0x181   :  { %2563 = vmatpush.bf16.msrb.mxu0 %v4132_v7  ;;  %2905 = vmatpush.bf16.msrb.mxu1 %v4713_v31 }
 0x182   :  { %2603 = vmatmul.bf16.vlgmr.msra.gmra.mxu2 %v4963_v61  ;;  %v4200_v61 = vor.u32 %v4686_v49, %v4197_v50  ;;  %2894 = vmatpush.bf16.msrb.mxu3 %v4703_v26  ;;  %v4720_v50 = vld [vmem:[%s5107_s5 + $0x98] sm:$0xff] }
 0x183   :  { %2915 = vmatpush.bf16.msrb.mxu2 %v4724_v36 }
 0x184   :  { %2564 = vmatmul.bf16.vlgmr.msrb.gmra.mxu0 %v4971_v34 }
 0x185   :  { %2608 = vmatpush.bf16.msra.mxu0 %v4248_v16  ;;  %2906 = vmatpush.bf16.msrb.mxu1 %v4712_v33 }
 0x186   :  { %2895 = vmatpush.bf16.msrb.mxu3 %v4702_v51 }
 0x187   :  { %v2435_v58 = vpop.f32.mrf.mxu1  ;;  %2916 = vmatpush.bf16.msrb.mxu2 %v4723_v42 }
 0x188   :  { %v4984_v60 = vadd.f32 %v2435_v58, %v2423_v30 }
 0x189   :  { %2609 = vmatpush.bf16.msra.mxu0 %v4232_v28  ;;  %2907 = vmatpush.bf16.msrb.mxu1 %v4711_v41 }
 0x18a   :  { %2896 = vmatpush.bf16.msrb.mxu3 %v4701_v2 }
 0x18b   :  { %2917 = vmatpush.bf16.msrb.mxu2 %v4722_v6 }
 0x18d   :  { %2610 = vmatpush.bf16.msra.mxu0 %v4216_v48  ;;  %2908 = vmatpush.bf16.msrb.mxu1 %v4710_v10 }
 0x18f   :  { %v2437_v46 = vpop.f32.mrf.mxu1  ;;  %2918 = vmatpush.bf16.msrb.mxu2 %v4721_v47 }
 0x191   :  { %2611 = vmatpush.bf16.msra.mxu0 %v4200_v61  ;;  %2909 = vmatpush.bf16.msrb.mxu1 %v4709_v44 }
 0x193   :  { %2919 = vmatpush.bf16.msrb.mxu2 %v4720_v50 }
 0x195   :  { %2612 = vmatpush.bf16.msra.mxu0 %v4184_v54 }
 0x197   :  { %v2474_v59 = vpop.f32.mrf.mxu3  ;;  %v2487_v12 = vpop.f32.mrf.mxu1  ;;  %2920 = vmatpush.bf16.msrb.mxu2 %v4719_v57 }
 0x198   :  { %v2475_v11 = vadd.f32 %v2474_v59, %v1766_v9 }
 0x199   :  { %2613 = vmatpush.bf16.msra.mxu0 %v4168_v63 }
 0x19a   :  { %v4987_v13 = vadd.f32 %v2487_v12, %v2475_v11  ;;  %v4727_v11 = vld [vmem:[%s5107_s5 + $0xd0] sm:$0xff] }
 0x19b   :  { %2921 = vmatpush.bf16.msrb.mxu2 %v4718_v53 }
 0x19d   :  { %2614 = vmatpush.bf16.msra.mxu0 %v4152_v3  ;;  %v4729_v3 = vld [vmem:[%s5107_s5 + $0xe0] sm:$0xff] }
 0x19f   :  { %v2476_v37 = vpop.f32.mrf.mxu3  ;;  %v2489_v15 = vpop.f32.mrf.mxu1  ;;  %2922 = vmatpush.bf16.msrb.mxu2 %v4717_v56 }
 0x1a0   :  { %v4728_v37 = vld [vmem:[%s5107_s5 + $0xd8] sm:$0xff]  ;;  %v4725_v15 = vld [vmem:[%s5107_s5 + $0xc0] sm:$0xff] }
 0x1a1   :  { %2615 = vmatpush.bf16.msra.mxu0 %v4136_v8 }
 0x1a4   :  { %2616 = vmatmul.bf16.vlgmr.msra.gmra.mxu0 %v4971_v34 }
 0x1a5   :  { %2928 = vmatpush.bf16.msrb.mxu0 %v4732_v35 }
 0x1af   :  { %v2539_v34 = vpop.f32.mrf.mxu1 }
 0x1b7   :  { %v2526_v17 = vpop.f32.mrf.mxu3  ;;  %v2541_v24 = vpop.f32.mrf.mxu1 }
 0x1b8   :  { %v2527_v62 = vadd.f32 %v2526_v17, %v1767_v55 }
 0x1ba   :  { %v5000_v19 = vadd.f32 %v2539_v34, %v2527_v62 }
 0x1bf   :  { %v2528_v21 = vpop.f32.mrf.mxu3 }
 0x1c3   :  { %v2448_v29 = vpop.f32.mrf.mxu2 }
 0x1c4   :  { %v2449_v52 = vadd.f32 %v2448_v29, %v4984_v60  ;;  %v4731_v60 = vld [vmem:[%s5107_s5 + $0xf0] sm:$0xff] }
 0x1c5   :  { %2929 = vmatpush.bf16.msrb.mxu0 %v4731_v60 }
 0x1c9   :  { %2930 = vmatpush.bf16.msrb.mxu0 %v4730_v0 }
 0x1cb   :  { %v2450_v7 = vpop.f32.mrf.mxu2 }
 0x1cd   :  { %2931 = vmatpush.bf16.msrb.mxu0 %v4729_v3 }
 0x1cf   :  { %v2591_v43 = vpop.f32.mrf.mxu1 }
 0x1d1   :  { %2932 = vmatpush.bf16.msrb.mxu0 %v4728_v37 }
 0x1d3   :  { %v2500_v49 = vpop.f32.mrf.mxu2 }
 0x1d4   :  { %v2501_v4 = vadd.f32 %v2500_v49, %v4987_v13  ;;  %v4726_v13 = vld [vmem:[%s5107_s5 + $0xc8] sm:$0xff] }
 0x1d5   :  { %2933 = vmatpush.bf16.msrb.mxu0 %v4727_v11 }
 0x1d7   :  { %v2578_v39 = vpop.f32.mrf.mxu3  ;;  %v2593_v48 = vpop.f32.mrf.mxu1 }
 0x1d8   :  { %v2579_v40 = vadd.f32 %v2578_v39, %v1768_v32  ;;  %v4737_v32 = vld [vmem:[%s5108_s6] ss:$0 sm:$0xff] }
 0x1d9   :  { %2934 = vmatpush.bf16.msrb.mxu0 %v4726_v13 }
 0x1da   :  { %v5042_v16 = vadd.f32 %v2591_v43, %v2579_v40 }
 0x1db   :  { %v2502_v61 = vpop.f32.mrf.mxu2 }
 0x1dd   :  { %2935 = vmatpush.bf16.msrb.mxu0 %v4725_v15 }
 0x1df   :  { %v2580_v28 = vpop.f32.mrf.mxu3 }
 0x1e1   :  { %v2461_v25 = vpop.f32.mrf.mxu0 }
 0x1e2   :  { %v2462_v54 = vadd.f32 %v2461_v25, %v2449_v52 }
 0x1e4   :  { %v2621_v30 = vmax.f32 %v2462_v54, 0.0 }
 0x1e5   :  { %v2552_v58 = vpop.f32.mrf.mxu2 }
 0x1e6   :  { %v2625_v59 = vpack.c.bf16 %v2621_v30, %v2621_v30  ;;  %v2553_v14 = vadd.f32 %v2552_v58, %v5000_v19 }
 0x1e8   :  { %2897 = vmatmul.bf16.vlgmr.msrb.gmra.mxu3 %v2625_v59 }
 0x1e9   :  { %v2463_v63 = vpop.f32.mrf.mxu0 }
 0x1ed   :  { %v2554_v1 = vpop.f32.mrf.mxu2 }
 0x1f1   :  { %v2513_v5 = vpop.f32.mrf.mxu0 }
 0x1f2   :  { %v2514_v46 = vadd.f32 %v2513_v5, %v2501_v4 }
 0x1f4   :  { %v2622_v8 = vmax.f32 %v2514_v46, 0.0 }
 0x1f6   :  { %v2626_v9 = vpack.c.bf16 %v2622_v8, %v2622_v8 }
 0x1f8   :  { %2910 = vmatmul.bf16.vlgmr.msrb.gmra.mxu1 %v2626_v9 }
 0x1f9   :  { %v2515_v12 = vpop.f32.mrf.mxu0 }
 0x201   :  { %v2565_v55 = vpop.f32.mrf.mxu0 }
 0x202   :  { %v2566_v45 = vadd.f32 %v2565_v55, %v2553_v14 }
 0x204   :  { %v2623_v62 = vmax.f32 %v2566_v45, 0.0 }
 0x205   :  { %v2604_v17 = vpop.f32.mrf.mxu2 }
 0x206   :  { %v2627_v18 = vpack.c.bf16 %v2623_v62, %v2623_v62  ;;  %v2605_v21 = vadd.f32 %v2604_v17, %v5042_v16 }
 0x208   :  { %2923 = vmatmul.bf16.vlgmr.msrb.gmra.mxu2 %v2627_v18 }
 0x209   :  { %v2567_v34 = vpop.f32.mrf.mxu0 }
 0x20d   :  { %v2606_v20 = vpop.f32.mrf.mxu2 }
 0x221   :  { %v2617_v22 = vpop.f32.mrf.mxu0 }
 0x222   :  { %v2618_v23 = vadd.f32 %v2617_v22, %v2605_v21 }
 0x224   :  { %v2624_v24 = vmax.f32 %v2618_v23, 0.0 }
 0x226   :  { %v2628_v26 = vpack.c.bf16 %v2624_v24, %v2624_v24 }
 0x228   :  { %2936 = vmatmul.bf16.vlgmr.msrb.gmra.mxu0 %v2628_v26 }
 0x229   :  { %v2619_v19 = vpop.f32.mrf.mxu0 }
 0x26b   :  { %v2898_v27 = vpop.f32.mrf.mxu3 }
 0x26c   :  { %v2899_v33 = vadd.f32 %v4737_v32, %v2898_v27 }
 0x273   :  { %v2900_v51 = vpop.f32.mrf.mxu3 }
 0x275   :  { %v2911_v38 = vpop.f32.mrf.mxu1 }
 0x276   :  { %v2912_v36 = vadd.f32 %v2911_v38, %v2899_v33 }
 0x27d   :  { %v2913_v2 = vpop.f32.mrf.mxu1 }
 0x28b   :  { %v2924_v31 = vpop.f32.mrf.mxu2 }
 0x28c   :  { %v2925_v39 = vadd.f32 %v2924_v31, %v2912_v36 }
 0x293   :  { %v2926_v29 = vpop.f32.mrf.mxu2 }
 0x2a5   :  { %v2937_v40 = vpop.f32.mrf.mxu0 }
 0x2a6   :  { %v2938_v41 = vadd.f32 %v2937_v40, %v2925_v39 }
 0x2a8   :  { %v2941_v42 = vpack.c.bf16 %v2938_v41, %v2938_v41 }
 0x2aa   :  { %2942 = vst [vmem:[%s5109_s7] sm:$0xf] %v2941_v42 }
 0x2ad   :  { %v2939_v43 = vpop.f32.mrf.mxu0 }
 0x2ae   :  { %2947 = vsyncpa [#allocation3], 1 }
 0x2af   :  { %2948 = vsyncpa [#allocation5], 1 }

</bundles_post_ra>
